<compile_context>
chip_gen: v6e
topology: v6e:2x2x1
jax: 0.10.0
libtpu: 0.0.40
codegen_flags: <defaults>
</compile_context>

<pallas_src>
import functools

import numpy as np

import jax
import jax.numpy as jnp
from jax import lax
from jax.experimental import pallas as pl
from jax.experimental.pallas import tpu as pltpu

# ----------------------------- synthetic config -----------------------------
NUM_MELS = 8
UPSAMPLE_INITIAL_CHANNEL = 32
UP_RATES = (2, 2)
UP_KS = (4, 4)
RES_KS = (3,)              # single MRF kernel -> the /num_kernels average is identity
RES_DILS = ((1, 3),)
LRELU_SLOPE = 0.1          # slope inside the generator / resblocks
POST_LRELU_SLOPE = 0.01    # PyTorch default before conv_post
MXU_DTYPE = jnp.bfloat16   # MXU operand dtype (f32 accumulation)


def get_padding(k, d):
    return (k * d - d) // 2


# --------------------- polyphase (phase-domain) packing ----------------------
def _conv_phase_taps(w, dilation, pad, n_ph):
    """Conv1d taps in the phase domain.  w: (C_out, C_in, K) PyTorch layout.

    Output phase r at column q reads input phase `src` at column q + delta,
    where src/delta come from the interleaved-time offset j*dilation - pad.
    """
    _, _, K = w.shape
    per_phase = []
    for r in range(n_ph):
        taps = []
        for j in range(K):
            off = j * dilation - pad
            taps.append(((r + off) % n_ph, (r + off) // n_ph, w[:, :, j]))
        per_phase.append(taps)
    return per_phase


def _convt_phase_taps(wt, stride, pad, n_ph_in):
    """ConvTranspose1d taps in the phase domain (n_ph_in -> n_ph_in*stride phases).

    wt: (C_in, C_out, K) PyTorch layout; the effective matrix per tap is wt[...,j].T.
    """
    _, _, K = wt.shape
    per_phase = []
    for rho in range(n_ph_in * stride):
        taps = []
        for j in range(K):
            if (rho + pad - j) % stride != 0:
                continue
            s_off = (rho + pad - j) // stride
            taps.append((s_off % n_ph_in, s_off // n_ph_in, wt[:, :, j].T))
        per_phase.append(taps)
    return per_phase


def _pack_phase_layer(per_phase_taps, c_in, c_out):
    """Merge ALL output phases of one layer into a single MXU matmul.

    slots = distinct (src_phase, lane_delta) pairs; packed weight is
    (n_phases*C_out, n_slots*C_in) with zero blocks where a phase does not use
    a slot, so the whole layer is ONE jnp.dot against shared im2col columns.
    """
    slots = tuple(sorted({(sp, d) for taps in per_phase_taps for sp, d, _ in taps}))
    sidx = {s: i for i, s in enumerate(slots)}
    W = np.zeros((len(per_phase_taps) * c_out, len(slots) * c_in), np.float32)
    for r, taps in enumerate(per_phase_taps):
        for sp, d, wmat in taps:
            s = sidx[(sp, d)]
            W[r * c_out:(r + 1) * c_out, s * c_in:(s + 1) * c_in] += np.asarray(wmat)
    return slots, W


def _generator_layer_defs():
    """Static layer structure, in kernel execution order."""
    assert len(RES_KS) == 1, "fused kernel assumes a single MRF kernel size"
    defs = []
    ch, n_ph = UPSAMPLE_INITIAL_CHANNEL, 1
    defs.append(dict(name="pre", kind="conv", n_ph=1, c_in=NUM_MELS, c_out=ch,
                     k=7, dil=1))
    for i, (u, k) in enumerate(zip(UP_RATES, UP_KS)):
        defs.append(dict(name=f"up{i}", kind="convt", n_ph=n_ph, stride=u,
                         c_in=ch, c_out=ch // 2, k=k))
        n_ph *= u
        ch //= 2
        for j, d in enumerate(RES_DILS[0]):
            defs.append(dict(name=f"res{i}_c1_{j}", kind="conv", n_ph=n_ph,
                             c_in=ch, c_out=ch, k=RES_KS[0], dil=d))
            defs.append(dict(name=f"res{i}_c2_{j}", kind="conv", n_ph=n_ph,
                             c_in=ch, c_out=ch, k=RES_KS[0], dil=1))
    defs.append(dict(name="post", kind="conv", n_ph=n_ph, c_in=ch, c_out=1,
                     k=7, dil=1))
    return defs


def init_params(key):
    """Synthetic PyTorch-layout weights (weight_norm assumed pre-folded)."""
    defs = _generator_layer_defs()
    keys = jax.random.split(key, 2 * len(defs))
    pt = {}
    for i, d in enumerate(defs):
        if d["kind"] == "conv":
            wshape = (d["c_out"], d["c_in"], d["k"])       # Conv1d layout
        else:
            wshape = (d["c_in"], d["c_out"], d["k"])       # ConvTranspose1d layout
        pt[d["name"] + "_w"] = jax.random.normal(keys[2 * i], wshape, jnp.float32) * 0.1
        pt[d["name"] + "_b"] = jax.random.normal(keys[2 * i + 1], (d["c_out"],),
                                                 jnp.float32) * 0.1
    return pt


def pack_params(pt):
    """Pack PyTorch-layout weights ONCE into phase-merged MXU matrices (bf16)."""
    defs = _generator_layer_defs()
    wb_flat, meta = [], []
    for d in defs:
        w = np.asarray(pt[d["name"] + "_w"], np.float32)
        b = np.asarray(pt[d["name"] + "_b"], np.float32)
        if d["kind"] == "conv":
            taps = _conv_phase_taps(w, d["dil"], get_padding(d["k"], d["dil"]),
                                    d["n_ph"])
            n_ph_out = d["n_ph"]
        else:
            taps = _convt_phase_taps(w, d["stride"], (d["k"] - d["stride"]) // 2,
                                     d["n_ph"])
            n_ph_out = d["n_ph"] * d["stride"]
        slots, W = _pack_phase_layer(taps, d["c_in"], d["c_out"])
        bias = np.tile(b, n_ph_out).reshape(n_ph_out * d["c_out"], 1)
        wb_flat += [jnp.asarray(W, MXU_DTYPE), jnp.asarray(bias, jnp.float32)]
        meta.append((slots, d["c_in"]))
    return wb_flat, tuple(meta)


# --------------------------------- kernel ------------------------------------
def _lrelu(x, slope):
    return jnp.where(x >= 0, x, slope * x)


def _vocoder_kernel(x_ref, *rest, meta, T, H, n_stages, n_res_pairs):
    """Whole HiFi-GAN generator for one batch element; activations stay in VMEM.

    rest = 2*len(meta) weight/bias refs, then out_ref, then 2 scratch refs.
    Layout: (channels x phases) on sublanes, time on lanes.
    """
    n_layers = len(meta)
    wb = rest[:2 * n_layers]
    out_ref = rest[2 * n_layers]
    res_ref, buf_ref = rest[2 * n_layers + 1:]

    def conv(idx):
        # One phase-merged conv / transposed conv: im2col columns from
        # (src_phase, lane_offset) slices of buf_ref -> a single MXU matmul.
        slots, c_in = meta[idx]
        cols = jnp.concatenate(
            [buf_ref[sp * c_in:(sp + 1) * c_in, H + d:H + d + T]
             for sp, d in slots], axis=0)
        w = wb[2 * idx][...]
        return jnp.dot(w, cols.astype(w.dtype),
                       preferred_element_type=jnp.float32) + wb[2 * idx + 1][...]

    def to_buf(val):
        buf_ref[:val.shape[0], H:H + T] = val

    # Zero ONLY the halo columns, once.  Interiors are always fully overwritten
    # afterwards, so the halos stay zero for the whole kernel -- this is what
    # realizes the zero-padded convolutions at the sequence edges.
    buf_ref[:, :H] = jnp.zeros((buf_ref.shape[0], H), buf_ref.dtype)
    buf_ref[:, H + T:] = jnp.zeros((buf_ref.shape[0], H), buf_ref.dtype)

    # ---- conv_pre (the mel occupies the first NUM_MELS sublanes) ----
    to_buf(x_ref[0])
    h = conv(0)
    idx = 1

    # ---- per upsample stage: leaky_relu -> ConvTranspose1d -> MRF(ResBlock1) ----
    for _ in range(n_stages):
        to_buf(_lrelu(h, LRELU_SLOPE))
        h = conv(idx); idx += 1                 # polyphase transposed conv
        rows = h.shape[0]
        res_ref[:rows, :] = h                   # residual `x`
        for _ in range(n_res_pairs):
            to_buf(_lrelu(res_ref[:rows, :], LRELU_SLOPE))
            xt = conv(idx); idx += 1            # convs1[j] (dilated)
            to_buf(_lrelu(xt, LRELU_SLOPE))
            xt = conv(idx); idx += 1            # convs2[j]
            res_ref[:rows, :] = res_ref[:rows, :] + xt
        h = res_ref[:rows, :]
        # len(RES_KS) == 1 -> the MRF average (xs / num_kernels) is the identity.

    # ---- leaky_relu(0.01) -> conv_post -> tanh ----
    to_buf(_lrelu(h, POST_LRELU_SLOPE))
    y = conv(idx)                               # (n_phases_total, T): 1 ch / phase
    out_ref[0] = jnp.tanh(y)


# ------------------------------- forward pass --------------------------------
@functools.partial(jax.jit, static_argnums=(2,))
def vocoder_forward(x, wb_flat, meta):
    """x: (B, T, num_mels) -> (B, 1, T * prod(UP_RATES))  (PyTorch NCW output)."""
    B, T, n_mels = x.shape
    # The x.transpose(1, 2) of Vocoder.forward: a tiny XLA pass over the
    # smallest tensor in the network (kept outside for robust lowering).
    x_ct = jnp.transpose(x, (0, 2, 1))

    n_ph_out = 1
    for u in UP_RATES:
        n_ph_out *= u
    H = max(max(abs(d) for _, d in slots) for slots, _ in meta)
    buf_rows = max(n_mels,
                   max(wb_flat[i].shape[0] for i in range(0, len(wb_flat), 2)))

    kern = functools.partial(_vocoder_kernel, meta=meta, T=T, H=H,
                             n_stages=len(UP_RATES), n_res_pairs=len(RES_DILS[0]))

    in_specs = [pl.BlockSpec((1, n_mels, T), lambda b: (b, 0, 0))]
    # Weights/biases: full blocks, constant index_map -> fetched once, resident.
    in_specs += [pl.BlockSpec(w.shape, lambda b: (0, 0)) for w in wb_flat]

    ph = pl.pallas_call(
        kern,
        out_shape=jax.ShapeDtypeStruct((B, n_ph_out, T), jnp.float32),
        grid=(B,),
        in_specs=in_specs,
        out_specs=pl.BlockSpec((1, n_ph_out, T), lambda b: (b, 0, 0)),
        scratch_shapes=[pltpu.VMEM((buf_rows, T), jnp.float32),          # residual x
                        pltpu.VMEM((buf_rows, T + 2 * H), jnp.float32)], # im2col buf
        compiler_params=pltpu.CompilerParams(dimension_semantics=("parallel",)),
    )(x_ct, *wb_flat)

    # Interleave the prod(UP_RATES) single-channel phase streams into the final
    # waveform: out[b, 0, n_ph*q + p] = ph[b, p, q] (touches only 1 channel).
    return jnp.transpose(ph, (0, 2, 1)).reshape(B, 1, n_ph_out * T)


# ----------------------------- pure-JAX reference ----------------------------
def reference_forward(x, pt):
    """f32 reference of Generator(x.transpose(1, 2)) via lax convolutions."""
    def conv(h, name, dil):
        w, b = pt[name + "_w"], pt[name + "_b"]
        p = get_padding(w.shape[-1], dil)
        y = lax.conv_general_dilated(h, w, (1,), [(p, p)], rhs_dilation=(dil,),
                                     dimension_numbers=("NCH", "OIH", "NCH"))
        return y + b[None, :, None]

    def convt(h, name, stride):
        wt, b = pt[name + "_w"], pt[name + "_b"]
        K = wt.shape[-1]
        p = (K - stride) // 2
        w_eff = jnp.flip(jnp.transpose(wt, (1, 0, 2)), axis=-1)
        y = lax.conv_general_dilated(h, w_eff, (1,), [(K - 1 - p, K - 1 - p)],
                                     lhs_dilation=(stride,),
                                     dimension_numbers=("NCH", "OIH", "NCH"))
        return y + b[None, :, None]

    def lrelu(v, s):
        return jnp.where(v >= 0, v, s * v)

    h = conv(jnp.transpose(x, (0, 2, 1)), "pre", 1)
    for i, (u, _) in enumerate(zip(UP_RATES, UP_KS)):
        h = convt(lrelu(h, LRELU_SLOPE), f"up{i}", u)
        xres = h
        for j, d in enumerate(RES_DILS[0]):
            t = conv(lrelu(xres, LRELU_SLOPE), f"res{i}_c1_{j}", d)
            t = conv(lrelu(t, LRELU_SLOPE), f"res{i}_c2_{j}", 1)
            xres = xres + t
        h = xres
    return jnp.tanh(conv(lrelu(h, POST_LRELU_SLOPE), "post", 1))


# ----------------------------------- main -------------------------------------
if __name__ == "__main__":
    key = jax.random.PRNGKey(0)
    pkey, xkey = jax.random.split(key)
    pt = init_params(pkey)
    wb_flat, meta = pack_params(pt)

    B, T = 2, 16
    x = jax.random.normal(xkey, (B, T, NUM_MELS), jnp.float32)   # (B, T, num_mels)

    y = vocoder_forward(x, wb_flat, meta)
    y = jax.block_until_ready(y)

    t_out = T
    for u in UP_RATES:
        t_out *= u
    assert y.shape == (B, 1, t_out), y.shape
    assert bool(jnp.all(jnp.isfinite(y)))

    # bf16 MXU operands vs. the f32 reference -> tolerance, not exact match.
    y_ref = reference_forward(x, pt)
    assert float(jnp.max(jnp.abs(y - y_ref))) < 5e-2
    print("KERNEL_OK")
</pallas_src>

<mosaic_0001>
module attributes {stable_mosaic.version = 11 : i64} {
  func.func @_vocoder_kernel(%arg0: i32, %arg1: memref<1x8x16xf32, #tpu.memory_space<vmem>>, %arg2: memref<32x56xbf16, #tpu.memory_space<vmem>>, %arg3: memref<32x1xf32, #tpu.memory_space<vmem>>, %arg4: memref<32x96xbf16, #tpu.memory_space<vmem>>, %arg5: memref<32x1xf32, #tpu.memory_space<vmem>>, %arg6: memref<32x64xbf16, #tpu.memory_space<vmem>>, %arg7: memref<32x1xf32, #tpu.memory_space<vmem>>, %arg8: memref<32x64xbf16, #tpu.memory_space<vmem>>, %arg9: memref<32x1xf32, #tpu.memory_space<vmem>>, %arg10: memref<32x96xbf16, #tpu.memory_space<vmem>>, %arg11: memref<32x1xf32, #tpu.memory_space<vmem>>, %arg12: memref<32x64xbf16, #tpu.memory_space<vmem>>, %arg13: memref<32x1xf32, #tpu.memory_space<vmem>>, %arg14: memref<32x64xbf16, #tpu.memory_space<vmem>>, %arg15: memref<32x1xf32, #tpu.memory_space<vmem>>, %arg16: memref<32x48xbf16, #tpu.memory_space<vmem>>, %arg17: memref<32x1xf32, #tpu.memory_space<vmem>>, %arg18: memref<32x48xbf16, #tpu.memory_space<vmem>>, %arg19: memref<32x1xf32, #tpu.memory_space<vmem>>, %arg20: memref<32x80xbf16, #tpu.memory_space<vmem>>, %arg21: memref<32x1xf32, #tpu.memory_space<vmem>>, %arg22: memref<32x48xbf16, #tpu.memory_space<vmem>>, %arg23: memref<32x1xf32, #tpu.memory_space<vmem>>, %arg24: memref<4x80xbf16, #tpu.memory_space<vmem>>, %arg25: memref<4x1xf32, #tpu.memory_space<vmem>>, %arg26: memref<1x4x16xf32, #tpu.memory_space<vmem>>, %arg27: memref<32x16xf32, #tpu.memory_space<vmem>>, %arg28: memref<32x22xf32, #tpu.memory_space<vmem>>) attributes {dimension_semantics = [#tpu.dimension_semantics<parallel>], iteration_bounds = array<i64: 2>, scalar_prefetch = 0 : i64, scratch_operands = 2 : i64, tpu.core_type = #tpu.core_type<tc>, window_params = [{transform_indices = @transform_0, window_bounds = array<i64: 1, 8, 16>}, {pipeline_mode = #tpu.pipeline_mode<synchronous>, transform_indices = @transform_1, window_bounds = array<i64: 32, 56>}, {pipeline_mode = #tpu.pipeline_mode<synchronous>, transform_indices = @transform_2, window_bounds = array<i64: 32, 1>}, {pipeline_mode = #tpu.pipeline_mode<synchronous>, transform_indices = @transform_3, window_bounds = array<i64: 32, 96>}, {pipeline_mode = #tpu.pipeline_mode<synchronous>, transform_indices = @transform_4, window_bounds = array<i64: 32, 1>}, {pipeline_mode = #tpu.pipeline_mode<synchronous>, transform_indices = @transform_5, window_bounds = array<i64: 32, 64>}, {pipeline_mode = #tpu.pipeline_mode<synchronous>, transform_indices = @transform_6, window_bounds = array<i64: 32, 1>}, {pipeline_mode = #tpu.pipeline_mode<synchronous>, transform_indices = @transform_7, window_bounds = array<i64: 32, 64>}, {pipeline_mode = #tpu.pipeline_mode<synchronous>, transform_indices = @transform_8, window_bounds = array<i64: 32, 1>}, {pipeline_mode = #tpu.pipeline_mode<synchronous>, transform_indices = @transform_9, window_bounds = array<i64: 32, 96>}, {pipeline_mode = #tpu.pipeline_mode<synchronous>, transform_indices = @transform_10, window_bounds = array<i64: 32, 1>}, {pipeline_mode = #tpu.pipeline_mode<synchronous>, transform_indices = @transform_11, window_bounds = array<i64: 32, 64>}, {pipeline_mode = #tpu.pipeline_mode<synchronous>, transform_indices = @transform_12, window_bounds = array<i64: 32, 1>}, {pipeline_mode = #tpu.pipeline_mode<synchronous>, transform_indices = @transform_13, window_bounds = array<i64: 32, 64>}, {pipeline_mode = #tpu.pipeline_mode<synchronous>, transform_indices = @transform_14, window_bounds = array<i64: 32, 1>}, {pipeline_mode = #tpu.pipeline_mode<synchronous>, transform_indices = @transform_15, window_bounds = array<i64: 32, 48>}, {pipeline_mode = #tpu.pipeline_mode<synchronous>, transform_indices = @transform_16, window_bounds = array<i64: 32, 1>}, {pipeline_mode = #tpu.pipeline_mode<synchronous>, transform_indices = @transform_17, window_bounds = array<i64: 32, 48>}, {pipeline_mode = #tpu.pipeline_mode<synchronous>, transform_indices = @transform_18, window_bounds = array<i64: 32, 1>}, {pipeline_mode = #tpu.pipeline_mode<synchronous>, transform_indices = @transform_19, window_bounds = array<i64: 32, 80>}, {pipeline_mode = #tpu.pipeline_mode<synchronous>, transform_indices = @transform_20, window_bounds = array<i64: 32, 1>}, {pipeline_mode = #tpu.pipeline_mode<synchronous>, transform_indices = @transform_21, window_bounds = array<i64: 32, 48>}, {pipeline_mode = #tpu.pipeline_mode<synchronous>, transform_indices = @transform_22, window_bounds = array<i64: 32, 1>}, {pipeline_mode = #tpu.pipeline_mode<synchronous>, transform_indices = @transform_23, window_bounds = array<i64: 4, 80>}, {pipeline_mode = #tpu.pipeline_mode<synchronous>, transform_indices = @transform_24, window_bounds = array<i64: 4, 1>}, {transform_indices = @transform_25, window_bounds = array<i64: 1, 4, 16>}]} {
    %cst = arith.constant 0.000000e+00 : f32
    %0 = vector.broadcast %cst : f32 to vector<32x3xf32>
    %c0 = arith.constant 0 : index
    %c0_0 = arith.constant 0 : index
    %1 = vector.load %arg28[%c0, %c0_0] : memref<32x22xf32, #tpu.memory_space<vmem>>, vector<32x3xf32>
    tpu.vector_store %arg28[%c0, %c0_0], %0 {strides = array<i32>} : memref<32x22xf32, #tpu.memory_space<vmem>>, vector<32x3xf32>,
    %cst_1 = arith.constant 0.000000e+00 : f32
    %2 = vector.broadcast %cst_1 : f32 to vector<32x3xf32>
    %c0_2 = arith.constant 0 : index
    %c19 = arith.constant 19 : index
    %3 = vector.load %arg28[%c0_2, %c19] : memref<32x22xf32, #tpu.memory_space<vmem>>, vector<32x3xf32>
    tpu.vector_store %arg28[%c0_2, %c19], %2 {strides = array<i32>} : memref<32x22xf32, #tpu.memory_space<vmem>>, vector<32x3xf32>,
    %c0_3 = arith.constant 0 : index
    %c0_4 = arith.constant 0 : index
    %c0_5 = arith.constant 0 : index
    %4 = vector.load %arg1[%c0_3, %c0_4, %c0_5] : memref<1x8x16xf32, #tpu.memory_space<vmem>>, vector<1x8x16xf32>
    %5 = vector.shape_cast %4 : vector<1x8x16xf32> to vector<8x16xf32>
    %c0_6 = arith.constant 0 : index
    %c3 = arith.constant 3 : index
    %6 = vector.load %arg28[%c0_6, %c3] : memref<32x22xf32, #tpu.memory_space<vmem>>, vector<8x16xf32>
    tpu.vector_store %arg28[%c0_6, %c3], %5 {strides = array<i32>} : memref<32x22xf32, #tpu.memory_space<vmem>>, vector<8x16xf32>,
    %c0_7 = arith.constant 0 : index
    %c0_8 = arith.constant 0 : index
    %7 = vector.load %arg28[%c0_7, %c0_8] : memref<32x22xf32, #tpu.memory_space<vmem>>, vector<8x16xf32>
    %c0_9 = arith.constant 0 : index
    %c1 = arith.constant 1 : index
    %8 = vector.load %arg28[%c0_9, %c1] : memref<32x22xf32, #tpu.memory_space<vmem>>, vector<8x16xf32>
    %c0_10 = arith.constant 0 : index
    %c2 = arith.constant 2 : index
    %9 = vector.load %arg28[%c0_10, %c2] : memref<32x22xf32, #tpu.memory_space<vmem>>, vector<8x16xf32>
    %c0_11 = arith.constant 0 : index
    %c3_12 = arith.constant 3 : index
    %10 = vector.load %arg28[%c0_11, %c3_12] : memref<32x22xf32, #tpu.memory_space<vmem>>, vector<8x16xf32>
    %c0_13 = arith.constant 0 : index
    %c4 = arith.constant 4 : index
    %11 = vector.load %arg28[%c0_13, %c4] : memref<32x22xf32, #tpu.memory_space<vmem>>, vector<8x16xf32>
    %c0_14 = arith.constant 0 : index
    %c5 = arith.constant 5 : index
    %12 = vector.load %arg28[%c0_14, %c5] : memref<32x22xf32, #tpu.memory_space<vmem>>, vector<8x16xf32>
    %c0_15 = arith.constant 0 : index
    %c6 = arith.constant 6 : index
    %13 = vector.load %arg28[%c0_15, %c6] : memref<32x22xf32, #tpu.memory_space<vmem>>, vector<8x16xf32>
    %14 = tpu.concatenate %7, %8, %9, %10, %11, %12, %13 in 0 : vector<8x16xf32>, vector<8x16xf32>, vector<8x16xf32>, vector<8x16xf32>, vector<8x16xf32>, vector<8x16xf32>, vector<8x16xf32> -> vector<56x16xf32>
    %c0_16 = arith.constant 0 : index
    %c0_17 = arith.constant 0 : index
    %15 = vector.load %arg2[%c0_16, %c0_17] : memref<32x56xbf16, #tpu.memory_space<vmem>>, vector<32x56xbf16>
    %16 = arith.truncf %14 : vector<56x16xf32> to vector<56x16xbf16>
    %cst_18 = arith.constant dense<0.000000e+00> : vector<32x16xf32>
    %17 = tpu.matmul %15, %16, %cst_18 {dimension_numbers = #tpu.dot_dimension_numbers<[1], [0], [0], [1], [0, 0, 1, 1], [], []>} : vector<32x56xbf16>, vector<56x16xbf16>, vector<32x16xf32> -> vector<32x16xf32>
    %c0_19 = arith.constant 0 : index
    %c0_20 = arith.constant 0 : index
    %18 = vector.load %arg3[%c0_19, %c0_20] : memref<32x1xf32, #tpu.memory_space<vmem>>, vector<32x1xf32>
    %19 = vector.broadcast %18 : vector<32x1xf32> to vector<32x16xf32>
    %20 = arith.addf %17, %19 : vector<32x16xf32>
    %cst_21 = arith.constant 0.000000e+00 : f32
    %21 = vector.broadcast %cst_21 : f32 to vector<32x16xf32>
    %22 = arith.cmpf oge, %20, %21 : vector<32x16xf32>
    %cst_22 = arith.constant 1.000000e-01 : f32
    %23 = vector.broadcast %cst_22 : f32 to vector<32x16xf32>
    %24 = arith.mulf %23, %20 : vector<32x16xf32>
    %25 = arith.select %22, %20, %24 : vector<32x16xi1>, vector<32x16xf32>
    %c0_23 = arith.constant 0 : index
    %c3_24 = arith.constant 3 : index
    %26 = vector.load %arg28[%c0_23, %c3_24] : memref<32x22xf32, #tpu.memory_space<vmem>>, vector<32x16xf32>
    tpu.vector_store %arg28[%c0_23, %c3_24], %25 {strides = array<i32>} : memref<32x22xf32, #tpu.memory_space<vmem>>, vector<32x16xf32>,
    %c0_25 = arith.constant 0 : index
    %c2_26 = arith.constant 2 : index
    %27 = vector.load %arg28[%c0_25, %c2_26] : memref<32x22xf32, #tpu.memory_space<vmem>>, vector<32x16xf32>
    %c0_27 = arith.constant 0 : index
    %c3_28 = arith.constant 3 : index
    %28 = vector.load %arg28[%c0_27, %c3_28] : memref<32x22xf32, #tpu.memory_space<vmem>>, vector<32x16xf32>
    %c0_29 = arith.constant 0 : index
    %c4_30 = arith.constant 4 : index
    %29 = vector.load %arg28[%c0_29, %c4_30] : memref<32x22xf32, #tpu.memory_space<vmem>>, vector<32x16xf32>
    %30 = tpu.concatenate %27, %28, %29 in 0 : vector<32x16xf32>, vector<32x16xf32>, vector<32x16xf32> -> vector<96x16xf32>
    %c0_31 = arith.constant 0 : index
    %c0_32 = arith.constant 0 : index
    %31 = vector.load %arg4[%c0_31, %c0_32] : memref<32x96xbf16, #tpu.memory_space<vmem>>, vector<32x96xbf16>
    %32 = arith.truncf %30 : vector<96x16xf32> to vector<96x16xbf16>
    %cst_33 = arith.constant dense<0.000000e+00> : vector<32x16xf32>
    %33 = tpu.matmul %31, %32, %cst_33 {dimension_numbers = #tpu.dot_dimension_numbers<[1], [0], [0], [1], [0, 0, 1, 1], [], []>} : vector<32x96xbf16>, vector<96x16xbf16>, vector<32x16xf32> -> vector<32x16xf32>
    %c0_34 = arith.constant 0 : index
    %c0_35 = arith.constant 0 : index
    %34 = vector.load %arg5[%c0_34, %c0_35] : memref<32x1xf32, #tpu.memory_space<vmem>>, vector<32x1xf32>
    %35 = vector.broadcast %34 : vector<32x1xf32> to vector<32x16xf32>
    %36 = arith.addf %33, %35 : vector<32x16xf32>
    %c0_36 = arith.constant 0 : index
    %c0_37 = arith.constant 0 : index
    %37 = vector.load %arg27[%c0_36, %c0_37] : memref<32x16xf32, #tpu.memory_space<vmem>>, vector<32x16xf32>
    tpu.vector_store %arg27[%c0_36, %c0_37], %36 {strides = array<i32>} : memref<32x16xf32, #tpu.memory_space<vmem>>, vector<32x16xf32>,
    %c0_38 = arith.constant 0 : index
    %c0_39 = arith.constant 0 : index
    %38 = vector.load %arg27[%c0_38, %c0_39] : memref<32x16xf32, #tpu.memory_space<vmem>>, vector<32x16xf32>
    %cst_40 = arith.constant 0.000000e+00 : f32
    %39 = vector.broadcast %cst_40 : f32 to vector<32x16xf32>
    %40 = arith.cmpf oge, %38, %39 : vector<32x16xf32>
    %cst_41 = arith.constant 1.000000e-01 : f32
    %41 = vector.broadcast %cst_41 : f32 to vector<32x16xf32>
    %42 = arith.mulf %41, %38 : vector<32x16xf32>
    %43 = arith.select %40, %38, %42 : vector<32x16xi1>, vector<32x16xf32>
    %c0_42 = arith.constant 0 : index
    %c3_43 = arith.constant 3 : index
    %44 = vector.load %arg28[%c0_42, %c3_43] : memref<32x22xf32, #tpu.memory_space<vmem>>, vector<32x16xf32>
    tpu.vector_store %arg28[%c0_42, %c3_43], %43 {strides = array<i32>} : memref<32x22xf32, #tpu.memory_space<vmem>>, vector<32x16xf32>,
    %c0_44 = arith.constant 0 : index
    %c3_45 = arith.constant 3 : index
    %45 = vector.load %arg28[%c0_44, %c3_45] : memref<32x22xf32, #tpu.memory_space<vmem>>, vector<16x16xf32>
    %c0_46 = arith.constant 0 : index
    %c4_47 = arith.constant 4 : index
    %46 = vector.load %arg28[%c0_46, %c4_47] : memref<32x22xf32, #tpu.memory_space<vmem>>, vector<16x16xf32>
    %c16 = arith.constant 16 : index
    %c2_48 = arith.constant 2 : index
    %47 = vector.load %arg28[%c16, %c2_48] : memref<32x22xf32, #tpu.memory_space<vmem>>, vector<16x16xf32>
    %c16_49 = arith.constant 16 : index
    %c3_50 = arith.constant 3 : index
    %48 = vector.load %arg28[%c16_49, %c3_50] : memref<32x22xf32, #tpu.memory_space<vmem>>, vector<16x16xf32>
    %49 = tpu.concatenate %45, %46, %47, %48 in 0 : vector<16x16xf32>, vector<16x16xf32>, vector<16x16xf32>, vector<16x16xf32> -> vector<64x16xf32>
    %c0_51 = arith.constant 0 : index
    %c0_52 = arith.constant 0 : index
    %50 = vector.load %arg6[%c0_51, %c0_52] : memref<32x64xbf16, #tpu.memory_space<vmem>>, vector<32x64xbf16>
    %51 = arith.truncf %49 : vector<64x16xf32> to vector<64x16xbf16>
    %cst_53 = arith.constant dense<0.000000e+00> : vector<32x16xf32>
    %52 = tpu.matmul %50, %51, %cst_53 {dimension_numbers = #tpu.dot_dimension_numbers<[1], [0], [0], [1], [0, 0, 1, 1], [], []>} : vector<32x64xbf16>, vector<64x16xbf16>, vector<32x16xf32> -> vector<32x16xf32>
    %c0_54 = arith.constant 0 : index
    %c0_55 = arith.constant 0 : index
    %53 = vector.load %arg7[%c0_54, %c0_55] : memref<32x1xf32, #tpu.memory_space<vmem>>, vector<32x1xf32>
    %54 = vector.broadcast %53 : vector<32x1xf32> to vector<32x16xf32>
    %55 = arith.addf %52, %54 : vector<32x16xf32>
    %cst_56 = arith.constant 0.000000e+00 : f32
    %56 = vector.broadcast %cst_56 : f32 to vector<32x16xf32>
    %57 = arith.cmpf oge, %55, %56 : vector<32x16xf32>
    %cst_57 = arith.constant 1.000000e-01 : f32
    %58 = vector.broadcast %cst_57 : f32 to vector<32x16xf32>
    %59 = arith.mulf %58, %55 : vector<32x16xf32>
    %60 = arith.select %57, %55, %59 : vector<32x16xi1>, vector<32x16xf32>
    %c0_58 = arith.constant 0 : index
    %c3_59 = arith.constant 3 : index
    %61 = vector.load %arg28[%c0_58, %c3_59] : memref<32x22xf32, #tpu.memory_space<vmem>>, vector<32x16xf32>
    tpu.vector_store %arg28[%c0_58, %c3_59], %60 {strides = array<i32>} : memref<32x22xf32, #tpu.memory_space<vmem>>, vector<32x16xf32>,
    %c0_60 = arith.constant 0 : index
    %c3_61 = arith.constant 3 : index
    %62 = vector.load %arg28[%c0_60, %c3_61] : memref<32x22xf32, #tpu.memory_space<vmem>>, vector<16x16xf32>
    %c0_62 = arith.constant 0 : index
    %c4_63 = arith.constant 4 : index
    %63 = vector.load %arg28[%c0_62, %c4_63] : memref<32x22xf32, #tpu.memory_space<vmem>>, vector<16x16xf32>
    %c16_64 = arith.constant 16 : index
    %c2_65 = arith.constant 2 : index
    %64 = vector.load %arg28[%c16_64, %c2_65] : memref<32x22xf32, #tpu.memory_space<vmem>>, vector<16x16xf32>
    %c16_66 = arith.constant 16 : index
    %c3_67 = arith.constant 3 : index
    %65 = vector.load %arg28[%c16_66, %c3_67] : memref<32x22xf32, #tpu.memory_space<vmem>>, vector<16x16xf32>
    %66 = tpu.concatenate %62, %63, %64, %65 in 0 : vector<16x16xf32>, vector<16x16xf32>, vector<16x16xf32>, vector<16x16xf32> -> vector<64x16xf32>
    %c0_68 = arith.constant 0 : index
    %c0_69 = arith.constant 0 : index
    %67 = vector.load %arg8[%c0_68, %c0_69] : memref<32x64xbf16, #tpu.memory_space<vmem>>, vector<32x64xbf16>
    %68 = arith.truncf %66 : vector<64x16xf32> to vector<64x16xbf16>
    %cst_70 = arith.constant dense<0.000000e+00> : vector<32x16xf32>
    %69 = tpu.matmul %67, %68, %cst_70 {dimension_numbers = #tpu.dot_dimension_numbers<[1], [0], [0], [1], [0, 0, 1, 1], [], []>} : vector<32x64xbf16>, vector<64x16xbf16>, vector<32x16xf32> -> vector<32x16xf32>
    %c0_71 = arith.constant 0 : index
    %c0_72 = arith.constant 0 : index
    %70 = vector.load %arg9[%c0_71, %c0_72] : memref<32x1xf32, #tpu.memory_space<vmem>>, vector<32x1xf32>
    %71 = vector.broadcast %70 : vector<32x1xf32> to vector<32x16xf32>
    %72 = arith.addf %69, %71 : vector<32x16xf32>
    %c0_73 = arith.constant 0 : index
    %c0_74 = arith.constant 0 : index
    %73 = vector.load %arg27[%c0_73, %c0_74] : memref<32x16xf32, #tpu.memory_space<vmem>>, vector<32x16xf32>
    %74 = arith.addf %73, %72 : vector<32x16xf32>
    %c0_75 = arith.constant 0 : index
    %c0_76 = arith.constant 0 : index
    %75 = vector.load %arg27[%c0_75, %c0_76] : memref<32x16xf32, #tpu.memory_space<vmem>>, vector<32x16xf32>
    tpu.vector_store %arg27[%c0_75, %c0_76], %74 {strides = array<i32>} : memref<32x16xf32, #tpu.memory_space<vmem>>, vector<32x16xf32>,
    %c0_77 = arith.constant 0 : index
    %c0_78 = arith.constant 0 : index
    %76 = vector.load %arg27[%c0_77, %c0_78] : memref<32x16xf32, #tpu.memory_space<vmem>>, vector<32x16xf32>
    %cst_79 = arith.constant 0.000000e+00 : f32
    %77 = vector.broadcast %cst_79 : f32 to vector<32x16xf32>
    %78 = arith.cmpf oge, %76, %77 : vector<32x16xf32>
    %cst_80 = arith.constant 1.000000e-01 : f32
    %79 = vector.broadcast %cst_80 : f32 to vector<32x16xf32>
    %80 = arith.mulf %79, %76 : vector<32x16xf32>
    %81 = arith.select %78, %76, %80 : vector<32x16xi1>, vector<32x16xf32>
    %c0_81 = arith.constant 0 : index
    %c3_82 = arith.constant 3 : index
    %82 = vector.load %arg28[%c0_81, %c3_82] : memref<32x22xf32, #tpu.memory_space<vmem>>, vector<32x16xf32>
    tpu.vector_store %arg28[%c0_81, %c3_82], %81 {strides = array<i32>} : memref<32x22xf32, #tpu.memory_space<vmem>>, vector<32x16xf32>,
    %c0_83 = arith.constant 0 : index
    %c2_84 = arith.constant 2 : index
    %83 = vector.load %arg28[%c0_83, %c2_84] : memref<32x22xf32, #tpu.memory_space<vmem>>, vector<16x16xf32>
    %c0_85 = arith.constant 0 : index
    %c3_86 = arith.constant 3 : index
    %84 = vector.load %arg28[%c0_85, %c3_86] : memref<32x22xf32, #tpu.memory_space<vmem>>, vector<16x16xf32>
    %c0_87 = arith.constant 0 : index
    %c5_88 = arith.constant 5 : index
    %85 = vector.load %arg28[%c0_87, %c5_88] : memref<32x22xf32, #tpu.memory_space<vmem>>, vector<16x16xf32>
    %c16_89 = arith.constant 16 : index
    %c1_90 = arith.constant 1 : index
    %86 = vector.load %arg28[%c16_89, %c1_90] : memref<32x22xf32, #tpu.memory_space<vmem>>, vector<16x16xf32>
    %c16_91 = arith.constant 16 : index
    %c3_92 = arith.constant 3 : index
    %87 = vector.load %arg28[%c16_91, %c3_92] : memref<32x22xf32, #tpu.memory_space<vmem>>, vector<16x16xf32>
    %c16_93 = arith.constant 16 : index
    %c4_94 = arith.constant 4 : index
    %88 = vector.load %arg28[%c16_93, %c4_94] : memref<32x22xf32, #tpu.memory_space<vmem>>, vector<16x16xf32>
    %89 = tpu.concatenate %83, %84, %85, %86, %87, %88 in 0 : vector<16x16xf32>, vector<16x16xf32>, vector<16x16xf32>, vector<16x16xf32>, vector<16x16xf32>, vector<16x16xf32> -> vector<96x16xf32>
    %c0_95 = arith.constant 0 : index
    %c0_96 = arith.constant 0 : index
    %90 = vector.load %arg10[%c0_95, %c0_96] : memref<32x96xbf16, #tpu.memory_space<vmem>>, vector<32x96xbf16>
    %91 = arith.truncf %89 : vector<96x16xf32> to vector<96x16xbf16>
    %cst_97 = arith.constant dense<0.000000e+00> : vector<32x16xf32>
    %92 = tpu.matmul %90, %91, %cst_97 {dimension_numbers = #tpu.dot_dimension_numbers<[1], [0], [0], [1], [0, 0, 1, 1], [], []>} : vector<32x96xbf16>, vector<96x16xbf16>, vector<32x16xf32> -> vector<32x16xf32>
    %c0_98 = arith.constant 0 : index
    %c0_99 = arith.constant 0 : index
    %93 = vector.load %arg11[%c0_98, %c0_99] : memref<32x1xf32, #tpu.memory_space<vmem>>, vector<32x1xf32>
    %94 = vector.broadcast %93 : vector<32x1xf32> to vector<32x16xf32>
    %95 = arith.addf %92, %94 : vector<32x16xf32>
    %cst_100 = arith.constant 0.000000e+00 : f32
    %96 = vector.broadcast %cst_100 : f32 to vector<32x16xf32>
    %97 = arith.cmpf oge, %95, %96 : vector<32x16xf32>
    %cst_101 = arith.constant 1.000000e-01 : f32
    %98 = vector.broadcast %cst_101 : f32 to vector<32x16xf32>
    %99 = arith.mulf %98, %95 : vector<32x16xf32>
    %100 = arith.select %97, %95, %99 : vector<32x16xi1>, vector<32x16xf32>
    %c0_102 = arith.constant 0 : index
    %c3_103 = arith.constant 3 : index
    %101 = vector.load %arg28[%c0_102, %c3_103] : memref<32x22xf32, #tpu.memory_space<vmem>>, vector<32x16xf32>
    tpu.vector_store %arg28[%c0_102, %c3_103], %100 {strides = array<i32>} : memref<32x22xf32, #tpu.memory_space<vmem>>, vector<32x16xf32>,
    %c0_104 = arith.constant 0 : index
    %c3_105 = arith.constant 3 : index
    %102 = vector.load %arg28[%c0_104, %c3_105] : memref<32x22xf32, #tpu.memory_space<vmem>>, vector<16x16xf32>
    %c0_106 = arith.constant 0 : index
    %c4_107 = arith.constant 4 : index
    %103 = vector.load %arg28[%c0_106, %c4_107] : memref<32x22xf32, #tpu.memory_space<vmem>>, vector<16x16xf32>
    %c16_108 = arith.constant 16 : index
    %c2_109 = arith.constant 2 : index
    %104 = vector.load %arg28[%c16_108, %c2_109] : memref<32x22xf32, #tpu.memory_space<vmem>>, vector<16x16xf32>
    %c16_110 = arith.constant 16 : index
    %c3_111 = arith.constant 3 : index
    %105 = vector.load %arg28[%c16_110, %c3_111] : memref<32x22xf32, #tpu.memory_space<vmem>>, vector<16x16xf32>
    %106 = tpu.concatenate %102, %103, %104, %105 in 0 : vector<16x16xf32>, vector<16x16xf32>, vector<16x16xf32>, vector<16x16xf32> -> vector<64x16xf32>
    %c0_112 = arith.constant 0 : index
    %c0_113 = arith.constant 0 : index
    %107 = vector.load %arg12[%c0_112, %c0_113] : memref<32x64xbf16, #tpu.memory_space<vmem>>, vector<32x64xbf16>
    %108 = arith.truncf %106 : vector<64x16xf32> to vector<64x16xbf16>
    %cst_114 = arith.constant dense<0.000000e+00> : vector<32x16xf32>
    %109 = tpu.matmul %107, %108, %cst_114 {dimension_numbers = #tpu.dot_dimension_numbers<[1], [0], [0], [1], [0, 0, 1, 1], [], []>} : vector<32x64xbf16>, vector<64x16xbf16>, vector<32x16xf32> -> vector<32x16xf32>
    %c0_115 = arith.constant 0 : index
    %c0_116 = arith.constant 0 : index
    %110 = vector.load %arg13[%c0_115, %c0_116] : memref<32x1xf32, #tpu.memory_space<vmem>>, vector<32x1xf32>
    %111 = vector.broadcast %110 : vector<32x1xf32> to vector<32x16xf32>
    %112 = arith.addf %109, %111 : vector<32x16xf32>
    %c0_117 = arith.constant 0 : index
    %c0_118 = arith.constant 0 : index
    %113 = vector.load %arg27[%c0_117, %c0_118] : memref<32x16xf32, #tpu.memory_space<vmem>>, vector<32x16xf32>
    %114 = arith.addf %113, %112 : vector<32x16xf32>
    %c0_119 = arith.constant 0 : index
    %c0_120 = arith.constant 0 : index
    %115 = vector.load %arg27[%c0_119, %c0_120] : memref<32x16xf32, #tpu.memory_space<vmem>>, vector<32x16xf32>
    tpu.vector_store %arg27[%c0_119, %c0_120], %114 {strides = array<i32>} : memref<32x16xf32, #tpu.memory_space<vmem>>, vector<32x16xf32>,
    %c0_121 = arith.constant 0 : index
    %c0_122 = arith.constant 0 : index
    %116 = vector.load %arg27[%c0_121, %c0_122] : memref<32x16xf32, #tpu.memory_space<vmem>>, vector<32x16xf32>
    %cst_123 = arith.constant 0.000000e+00 : f32
    %117 = vector.broadcast %cst_123 : f32 to vector<32x16xf32>
    %118 = arith.cmpf oge, %116, %117 : vector<32x16xf32>
    %cst_124 = arith.constant 1.000000e-01 : f32
    %119 = vector.broadcast %cst_124 : f32 to vector<32x16xf32>
    %120 = arith.mulf %119, %116 : vector<32x16xf32>
    %121 = arith.select %118, %116, %120 : vector<32x16xi1>, vector<32x16xf32>
    %c0_125 = arith.constant 0 : index
    %c3_126 = arith.constant 3 : index
    %122 = vector.load %arg28[%c0_125, %c3_126] : memref<32x22xf32, #tpu.memory_space<vmem>>, vector<32x16xf32>
    tpu.vector_store %arg28[%c0_125, %c3_126], %121 {strides = array<i32>} : memref<32x22xf32, #tpu.memory_space<vmem>>, vector<32x16xf32>,
    %c0_127 = arith.constant 0 : index
    %c3_128 = arith.constant 3 : index
    %123 = vector.load %arg28[%c0_127, %c3_128] : memref<32x22xf32, #tpu.memory_space<vmem>>, vector<16x16xf32>
    %c0_129 = arith.constant 0 : index
    %c4_130 = arith.constant 4 : index
    %124 = vector.load %arg28[%c0_129, %c4_130] : memref<32x22xf32, #tpu.memory_space<vmem>>, vector<16x16xf32>
    %c16_131 = arith.constant 16 : index
    %c2_132 = arith.constant 2 : index
    %125 = vector.load %arg28[%c16_131, %c2_132] : memref<32x22xf32, #tpu.memory_space<vmem>>, vector<16x16xf32>
    %c16_133 = arith.constant 16 : index
    %c3_134 = arith.constant 3 : index
    %126 = vector.load %arg28[%c16_133, %c3_134] : memref<32x22xf32, #tpu.memory_space<vmem>>, vector<16x16xf32>
    %127 = tpu.concatenate %123, %124, %125, %126 in 0 : vector<16x16xf32>, vector<16x16xf32>, vector<16x16xf32>, vector<16x16xf32> -> vector<64x16xf32>
    %c0_135 = arith.constant 0 : index
    %c0_136 = arith.constant 0 : index
    %128 = vector.load %arg14[%c0_135, %c0_136] : memref<32x64xbf16, #tpu.memory_space<vmem>>, vector<32x64xbf16>
    %129 = arith.truncf %127 : vector<64x16xf32> to vector<64x16xbf16>
    %cst_137 = arith.constant dense<0.000000e+00> : vector<32x16xf32>
    %130 = tpu.matmul %128, %129, %cst_137 {dimension_numbers = #tpu.dot_dimension_numbers<[1], [0], [0], [1], [0, 0, 1, 1], [], []>} : vector<32x64xbf16>, vector<64x16xbf16>, vector<32x16xf32> -> vector<32x16xf32>
    %c0_138 = arith.constant 0 : index
    %c0_139 = arith.constant 0 : index
    %131 = vector.load %arg15[%c0_138, %c0_139] : memref<32x1xf32, #tpu.memory_space<vmem>>, vector<32x1xf32>
    %132 = vector.broadcast %131 : vector<32x1xf32> to vector<32x16xf32>
    %133 = arith.addf %130, %132 : vector<32x16xf32>
    %c0_140 = arith.constant 0 : index
    %c0_141 = arith.constant 0 : index
    %134 = vector.load %arg27[%c0_140, %c0_141] : memref<32x16xf32, #tpu.memory_space<vmem>>, vector<32x16xf32>
    tpu.vector_store %arg27[%c0_140, %c0_141], %133 {strides = array<i32>} : memref<32x16xf32, #tpu.memory_space<vmem>>, vector<32x16xf32>,
    %c0_142 = arith.constant 0 : index
    %c0_143 = arith.constant 0 : index
    %135 = vector.load %arg27[%c0_142, %c0_143] : memref<32x16xf32, #tpu.memory_space<vmem>>, vector<32x16xf32>
    %cst_144 = arith.constant 0.000000e+00 : f32
    %136 = vector.broadcast %cst_144 : f32 to vector<32x16xf32>
    %137 = arith.cmpf oge, %135, %136 : vector<32x16xf32>
    %cst_145 = arith.constant 1.000000e-01 : f32
    %138 = vector.broadcast %cst_145 : f32 to vector<32x16xf32>
    %139 = arith.mulf %138, %135 : vector<32x16xf32>
    %140 = arith.select %137, %135, %139 : vector<32x16xi1>, vector<32x16xf32>
    %c0_146 = arith.constant 0 : index
    %c3_147 = arith.constant 3 : index
    %141 = vector.load %arg28[%c0_146, %c3_147] : memref<32x22xf32, #tpu.memory_space<vmem>>, vector<32x16xf32>
    tpu.vector_store %arg28[%c0_146, %c3_147], %140 {strides = array<i32>} : memref<32x22xf32, #tpu.memory_space<vmem>>, vector<32x16xf32>,
    %c0_148 = arith.constant 0 : index
    %c3_149 = arith.constant 3 : index
    %142 = vector.load %arg28[%c0_148, %c3_149] : memref<32x22xf32, #tpu.memory_space<vmem>>, vector<8x16xf32>
    %c0_150 = arith.constant 0 : index
    %c4_151 = arith.constant 4 : index
    %143 = vector.load %arg28[%c0_150, %c4_151] : memref<32x22xf32, #tpu.memory_space<vmem>>, vector<8x16xf32>
    %c8 = arith.constant 8 : index
    %c3_152 = arith.constant 3 : index
    %144 = vector.load %arg28[%c8, %c3_152] : memref<32x22xf32, #tpu.memory_space<vmem>>, vector<8x16xf32>
    %c16_153 = arith.constant 16 : index
    %c3_154 = arith.constant 3 : index
    %145 = vector.load %arg28[%c16_153, %c3_154] : memref<32x22xf32, #tpu.memory_space<vmem>>, vector<8x16xf32>
    %c24 = arith.constant 24 : index
    %c2_155 = arith.constant 2 : index
    %146 = vector.load %arg28[%c24, %c2_155] : memref<32x22xf32, #tpu.memory_space<vmem>>, vector<8x16xf32>
    %c24_156 = arith.constant 24 : index
    %c3_157 = arith.constant 3 : index
    %147 = vector.load %arg28[%c24_156, %c3_157] : memref<32x22xf32, #tpu.memory_space<vmem>>, vector<8x16xf32>
    %148 = tpu.concatenate %142, %143, %144, %145, %146, %147 in 0 : vector<8x16xf32>, vector<8x16xf32>, vector<8x16xf32>, vector<8x16xf32>, vector<8x16xf32>, vector<8x16xf32> -> vector<48x16xf32>
    %c0_158 = arith.constant 0 : index
    %c0_159 = arith.constant 0 : index
    %149 = vector.load %arg16[%c0_158, %c0_159] : memref<32x48xbf16, #tpu.memory_space<vmem>>, vector<32x48xbf16>
    %150 = arith.truncf %148 : vector<48x16xf32> to vector<48x16xbf16>
    %cst_160 = arith.constant dense<0.000000e+00> : vector<32x16xf32>
    %151 = tpu.matmul %149, %150, %cst_160 {dimension_numbers = #tpu.dot_dimension_numbers<[1], [0], [0], [1], [0, 0, 1, 1], [], []>} : vector<32x48xbf16>, vector<48x16xbf16>, vector<32x16xf32> -> vector<32x16xf32>
    %c0_161 = arith.constant 0 : index
    %c0_162 = arith.constant 0 : index
    %152 = vector.load %arg17[%c0_161, %c0_162] : memref<32x1xf32, #tpu.memory_space<vmem>>, vector<32x1xf32>
    %153 = vector.broadcast %152 : vector<32x1xf32> to vector<32x16xf32>
    %154 = arith.addf %151, %153 : vector<32x16xf32>
    %cst_163 = arith.constant 0.000000e+00 : f32
    %155 = vector.broadcast %cst_163 : f32 to vector<32x16xf32>
    %156 = arith.cmpf oge, %154, %155 : vector<32x16xf32>
    %cst_164 = arith.constant 1.000000e-01 : f32
    %157 = vector.broadcast %cst_164 : f32 to vector<32x16xf32>
    %158 = arith.mulf %157, %154 : vector<32x16xf32>
    %159 = arith.select %156, %154, %158 : vector<32x16xi1>, vector<32x16xf32>
    %c0_165 = arith.constant 0 : index
    %c3_166 = arith.constant 3 : index
    %160 = vector.load %arg28[%c0_165, %c3_166] : memref<32x22xf32, #tpu.memory_space<vmem>>, vector<32x16xf32>
    tpu.vector_store %arg28[%c0_165, %c3_166], %159 {strides = array<i32>} : memref<32x22xf32, #tpu.memory_space<vmem>>, vector<32x16xf32>,
    %c0_167 = arith.constant 0 : index
    %c3_168 = arith.constant 3 : index
    %161 = vector.load %arg28[%c0_167, %c3_168] : memref<32x22xf32, #tpu.memory_space<vmem>>, vector<8x16xf32>
    %c0_169 = arith.constant 0 : index
    %c4_170 = arith.constant 4 : index
    %162 = vector.load %arg28[%c0_169, %c4_170] : memref<32x22xf32, #tpu.memory_space<vmem>>, vector<8x16xf32>
    %c8_171 = arith.constant 8 : index
    %c3_172 = arith.constant 3 : index
    %163 = vector.load %arg28[%c8_171, %c3_172] : memref<32x22xf32, #tpu.memory_space<vmem>>, vector<8x16xf32>
    %c16_173 = arith.constant 16 : index
    %c3_174 = arith.constant 3 : index
    %164 = vector.load %arg28[%c16_173, %c3_174] : memref<32x22xf32, #tpu.memory_space<vmem>>, vector<8x16xf32>
    %c24_175 = arith.constant 24 : index
    %c2_176 = arith.constant 2 : index
    %165 = vector.load %arg28[%c24_175, %c2_176] : memref<32x22xf32, #tpu.memory_space<vmem>>, vector<8x16xf32>
    %c24_177 = arith.constant 24 : index
    %c3_178 = arith.constant 3 : index
    %166 = vector.load %arg28[%c24_177, %c3_178] : memref<32x22xf32, #tpu.memory_space<vmem>>, vector<8x16xf32>
    %167 = tpu.concatenate %161, %162, %163, %164, %165, %166 in 0 : vector<8x16xf32>, vector<8x16xf32>, vector<8x16xf32>, vector<8x16xf32>, vector<8x16xf32>, vector<8x16xf32> -> vector<48x16xf32>
    %c0_179 = arith.constant 0 : index
    %c0_180 = arith.constant 0 : index
    %168 = vector.load %arg18[%c0_179, %c0_180] : memref<32x48xbf16, #tpu.memory_space<vmem>>, vector<32x48xbf16>
    %169 = arith.truncf %167 : vector<48x16xf32> to vector<48x16xbf16>
    %cst_181 = arith.constant dense<0.000000e+00> : vector<32x16xf32>
    %170 = tpu.matmul %168, %169, %cst_181 {dimension_numbers = #tpu.dot_dimension_numbers<[1], [0], [0], [1], [0, 0, 1, 1], [], []>} : vector<32x48xbf16>, vector<48x16xbf16>, vector<32x16xf32> -> vector<32x16xf32>
    %c0_182 = arith.constant 0 : index
    %c0_183 = arith.constant 0 : index
    %171 = vector.load %arg19[%c0_182, %c0_183] : memref<32x1xf32, #tpu.memory_space<vmem>>, vector<32x1xf32>
    %172 = vector.broadcast %171 : vector<32x1xf32> to vector<32x16xf32>
    %173 = arith.addf %170, %172 : vector<32x16xf32>
    %c0_184 = arith.constant 0 : index
    %c0_185 = arith.constant 0 : index
    %174 = vector.load %arg27[%c0_184, %c0_185] : memref<32x16xf32, #tpu.memory_space<vmem>>, vector<32x16xf32>
    %175 = arith.addf %174, %173 : vector<32x16xf32>
    %c0_186 = arith.constant 0 : index
    %c0_187 = arith.constant 0 : index
    %176 = vector.load %arg27[%c0_186, %c0_187] : memref<32x16xf32, #tpu.memory_space<vmem>>, vector<32x16xf32>
    tpu.vector_store %arg27[%c0_186, %c0_187], %175 {strides = array<i32>} : memref<32x16xf32, #tpu.memory_space<vmem>>, vector<32x16xf32>,
    %c0_188 = arith.constant 0 : index
    %c0_189 = arith.constant 0 : index
    %177 = vector.load %arg27[%c0_188, %c0_189] : memref<32x16xf32, #tpu.memory_space<vmem>>, vector<32x16xf32>
    %cst_190 = arith.constant 0.000000e+00 : f32
    %178 = vector.broadcast %cst_190 : f32 to vector<32x16xf32>
    %179 = arith.cmpf oge, %177, %178 : vector<32x16xf32>
    %cst_191 = arith.constant 1.000000e-01 : f32
    %180 = vector.broadcast %cst_191 : f32 to vector<32x16xf32>
    %181 = arith.mulf %180, %177 : vector<32x16xf32>
    %182 = arith.select %179, %177, %181 : vector<32x16xi1>, vector<32x16xf32>
    %c0_192 = arith.constant 0 : index
    %c3_193 = arith.constant 3 : index
    %183 = vector.load %arg28[%c0_192, %c3_193] : memref<32x22xf32, #tpu.memory_space<vmem>>, vector<32x16xf32>
    tpu.vector_store %arg28[%c0_192, %c3_193], %182 {strides = array<i32>} : memref<32x22xf32, #tpu.memory_space<vmem>>, vector<32x16xf32>,
    %c0_194 = arith.constant 0 : index
    %c3_195 = arith.constant 3 : index
    %184 = vector.load %arg28[%c0_194, %c3_195] : memref<32x22xf32, #tpu.memory_space<vmem>>, vector<8x16xf32>
    %c0_196 = arith.constant 0 : index
    %c4_197 = arith.constant 4 : index
    %185 = vector.load %arg28[%c0_196, %c4_197] : memref<32x22xf32, #tpu.memory_space<vmem>>, vector<8x16xf32>
    %c8_198 = arith.constant 8 : index
    %c2_199 = arith.constant 2 : index
    %186 = vector.load %arg28[%c8_198, %c2_199] : memref<32x22xf32, #tpu.memory_space<vmem>>, vector<8x16xf32>
    %c8_200 = arith.constant 8 : index
    %c3_201 = arith.constant 3 : index
    %187 = vector.load %arg28[%c8_200, %c3_201] : memref<32x22xf32, #tpu.memory_space<vmem>>, vector<8x16xf32>
    %c8_202 = arith.constant 8 : index
    %c4_203 = arith.constant 4 : index
    %188 = vector.load %arg28[%c8_202, %c4_203] : memref<32x22xf32, #tpu.memory_space<vmem>>, vector<8x16xf32>
    %c16_204 = arith.constant 16 : index
    %c2_205 = arith.constant 2 : index
    %189 = vector.load %arg28[%c16_204, %c2_205] : memref<32x22xf32, #tpu.memory_space<vmem>>, vector<8x16xf32>
    %c16_206 = arith.constant 16 : index
    %c3_207 = arith.constant 3 : index
    %190 = vector.load %arg28[%c16_206, %c3_207] : memref<32x22xf32, #tpu.memory_space<vmem>>, vector<8x16xf32>
    %c16_208 = arith.constant 16 : index
    %c4_209 = arith.constant 4 : index
    %191 = vector.load %arg28[%c16_208, %c4_209] : memref<32x22xf32, #tpu.memory_space<vmem>>, vector<8x16xf32>
    %c24_210 = arith.constant 24 : index
    %c2_211 = arith.constant 2 : index
    %192 = vector.load %arg28[%c24_210, %c2_211] : memref<32x22xf32, #tpu.memory_space<vmem>>, vector<8x16xf32>
    %c24_212 = arith.constant 24 : index
    %c3_213 = arith.constant 3 : index
    %193 = vector.load %arg28[%c24_212, %c3_213] : memref<32x22xf32, #tpu.memory_space<vmem>>, vector<8x16xf32>
    %194 = tpu.concatenate %184, %185, %186, %187, %188, %189, %190, %191, %192, %193 in 0 : vector<8x16xf32>, vector<8x16xf32>, vector<8x16xf32>, vector<8x16xf32>, vector<8x16xf32>, vector<8x16xf32>, vector<8x16xf32>, vector<8x16xf32>, vector<8x16xf32>, vector<8x16xf32> -> vector<80x16xf32>
    %c0_214 = arith.constant 0 : index
    %c0_215 = arith.constant 0 : index
    %195 = vector.load %arg20[%c0_214, %c0_215] : memref<32x80xbf16, #tpu.memory_space<vmem>>, vector<32x80xbf16>
    %196 = arith.truncf %194 : vector<80x16xf32> to vector<80x16xbf16>
    %cst_216 = arith.constant dense<0.000000e+00> : vector<32x16xf32>
    %197 = tpu.matmul %195, %196, %cst_216 {dimension_numbers = #tpu.dot_dimension_numbers<[1], [0], [0], [1], [0, 0, 1, 1], [], []>} : vector<32x80xbf16>, vector<80x16xbf16>, vector<32x16xf32> -> vector<32x16xf32>
    %c0_217 = arith.constant 0 : index
    %c0_218 = arith.constant 0 : index
    %198 = vector.load %arg21[%c0_217, %c0_218] : memref<32x1xf32, #tpu.memory_space<vmem>>, vector<32x1xf32>
    %199 = vector.broadcast %198 : vector<32x1xf32> to vector<32x16xf32>
    %200 = arith.addf %197, %199 : vector<32x16xf32>
    %cst_219 = arith.constant 0.000000e+00 : f32
    %201 = vector.broadcast %cst_219 : f32 to vector<32x16xf32>
    %202 = arith.cmpf oge, %200, %201 : vector<32x16xf32>
    %cst_220 = arith.constant 1.000000e-01 : f32
    %203 = vector.broadcast %cst_220 : f32 to vector<32x16xf32>
    %204 = arith.mulf %203, %200 : vector<32x16xf32>
    %205 = arith.select %202, %200, %204 : vector<32x16xi1>, vector<32x16xf32>
    %c0_221 = arith.constant 0 : index
    %c3_222 = arith.constant 3 : index
    %206 = vector.load %arg28[%c0_221, %c3_222] : memref<32x22xf32, #tpu.memory_space<vmem>>, vector<32x16xf32>
    tpu.vector_store %arg28[%c0_221, %c3_222], %205 {strides = array<i32>} : memref<32x22xf32, #tpu.memory_space<vmem>>, vector<32x16xf32>,
    %c0_223 = arith.constant 0 : index
    %c3_224 = arith.constant 3 : index
    %207 = vector.load %arg28[%c0_223, %c3_224] : memref<32x22xf32, #tpu.memory_space<vmem>>, vector<8x16xf32>
    %c0_225 = arith.constant 0 : index
    %c4_226 = arith.constant 4 : index
    %208 = vector.load %arg28[%c0_225, %c4_226] : memref<32x22xf32, #tpu.memory_space<vmem>>, vector<8x16xf32>
    %c8_227 = arith.constant 8 : index
    %c3_228 = arith.constant 3 : index
    %209 = vector.load %arg28[%c8_227, %c3_228] : memref<32x22xf32, #tpu.memory_space<vmem>>, vector<8x16xf32>
    %c16_229 = arith.constant 16 : index
    %c3_230 = arith.constant 3 : index
    %210 = vector.load %arg28[%c16_229, %c3_230] : memref<32x22xf32, #tpu.memory_space<vmem>>, vector<8x16xf32>
    %c24_231 = arith.constant 24 : index
    %c2_232 = arith.constant 2 : index
    %211 = vector.load %arg28[%c24_231, %c2_232] : memref<32x22xf32, #tpu.memory_space<vmem>>, vector<8x16xf32>
    %c24_233 = arith.constant 24 : index
    %c3_234 = arith.constant 3 : index
    %212 = vector.load %arg28[%c24_233, %c3_234] : memref<32x22xf32, #tpu.memory_space<vmem>>, vector<8x16xf32>
    %213 = tpu.concatenate %207, %208, %209, %210, %211, %212 in 0 : vector<8x16xf32>, vector<8x16xf32>, vector<8x16xf32>, vector<8x16xf32>, vector<8x16xf32>, vector<8x16xf32> -> vector<48x16xf32>
    %c0_235 = arith.constant 0 : index
    %c0_236 = arith.constant 0 : index
    %214 = vector.load %arg22[%c0_235, %c0_236] : memref<32x48xbf16, #tpu.memory_space<vmem>>, vector<32x48xbf16>
    %215 = arith.truncf %213 : vector<48x16xf32> to vector<48x16xbf16>
    %cst_237 = arith.constant dense<0.000000e+00> : vector<32x16xf32>
    %216 = tpu.matmul %214, %215, %cst_237 {dimension_numbers = #tpu.dot_dimension_numbers<[1], [0], [0], [1], [0, 0, 1, 1], [], []>} : vector<32x48xbf16>, vector<48x16xbf16>, vector<32x16xf32> -> vector<32x16xf32>
    %c0_238 = arith.constant 0 : index
    %c0_239 = arith.constant 0 : index
    %217 = vector.load %arg23[%c0_238, %c0_239] : memref<32x1xf32, #tpu.memory_space<vmem>>, vector<32x1xf32>
    %218 = vector.broadcast %217 : vector<32x1xf32> to vector<32x16xf32>
    %219 = arith.addf %216, %218 : vector<32x16xf32>
    %c0_240 = arith.constant 0 : index
    %c0_241 = arith.constant 0 : index
    %220 = vector.load %arg27[%c0_240, %c0_241] : memref<32x16xf32, #tpu.memory_space<vmem>>, vector<32x16xf32>
    %221 = arith.addf %220, %219 : vector<32x16xf32>
    %c0_242 = arith.constant 0 : index
    %c0_243 = arith.constant 0 : index
    %222 = vector.load %arg27[%c0_242, %c0_243] : memref<32x16xf32, #tpu.memory_space<vmem>>, vector<32x16xf32>
    tpu.vector_store %arg27[%c0_242, %c0_243], %221 {strides = array<i32>} : memref<32x16xf32, #tpu.memory_space<vmem>>, vector<32x16xf32>,
    %c0_244 = arith.constant 0 : index
    %c0_245 = arith.constant 0 : index
    %223 = vector.load %arg27[%c0_244, %c0_245] : memref<32x16xf32, #tpu.memory_space<vmem>>, vector<32x16xf32>
    %cst_246 = arith.constant 0.000000e+00 : f32
    %224 = vector.broadcast %cst_246 : f32 to vector<32x16xf32>
    %225 = arith.cmpf oge, %223, %224 : vector<32x16xf32>
    %cst_247 = arith.constant 0.00999999977 : f32
    %226 = vector.broadcast %cst_247 : f32 to vector<32x16xf32>
    %227 = arith.mulf %226, %223 : vector<32x16xf32>
    %228 = arith.select %225, %223, %227 : vector<32x16xi1>, vector<32x16xf32>
    %c0_248 = arith.constant 0 : index
    %c3_249 = arith.constant 3 : index
    %229 = vector.load %arg28[%c0_248, %c3_249] : memref<32x22xf32, #tpu.memory_space<vmem>>, vector<32x16xf32>
    tpu.vector_store %arg28[%c0_248, %c3_249], %228 {strides = array<i32>} : memref<32x22xf32, #tpu.memory_space<vmem>>, vector<32x16xf32>,
    %c0_250 = arith.constant 0 : index
    %c3_251 = arith.constant 3 : index
    %230 = vector.load %arg28[%c0_250, %c3_251] : memref<32x22xf32, #tpu.memory_space<vmem>>, vector<8x16xf32>
    %c0_252 = arith.constant 0 : index
    %c4_253 = arith.constant 4 : index
    %231 = vector.load %arg28[%c0_252, %c4_253] : memref<32x22xf32, #tpu.memory_space<vmem>>, vector<8x16xf32>
    %c8_254 = arith.constant 8 : index
    %c2_255 = arith.constant 2 : index
    %232 = vector.load %arg28[%c8_254, %c2_255] : memref<32x22xf32, #tpu.memory_space<vmem>>, vector<8x16xf32>
    %c8_256 = arith.constant 8 : index
    %c3_257 = arith.constant 3 : index
    %233 = vector.load %arg28[%c8_256, %c3_257] : memref<32x22xf32, #tpu.memory_space<vmem>>, vector<8x16xf32>
    %c8_258 = arith.constant 8 : index
    %c4_259 = arith.constant 4 : index
    %234 = vector.load %arg28[%c8_258, %c4_259] : memref<32x22xf32, #tpu.memory_space<vmem>>, vector<8x16xf32>
    %c16_260 = arith.constant 16 : index
    %c2_261 = arith.constant 2 : index
    %235 = vector.load %arg28[%c16_260, %c2_261] : memref<32x22xf32, #tpu.memory_space<vmem>>, vector<8x16xf32>
    %c16_262 = arith.constant 16 : index
    %c3_263 = arith.constant 3 : index
    %236 = vector.load %arg28[%c16_262, %c3_263] : memref<32x22xf32, #tpu.memory_space<vmem>>, vector<8x16xf32>
    %c16_264 = arith.constant 16 : index
    %c4_265 = arith.constant 4 : index
    %237 = vector.load %arg28[%c16_264, %c4_265] : memref<32x22xf32, #tpu.memory_space<vmem>>, vector<8x16xf32>
    %c24_266 = arith.constant 24 : index
    %c2_267 = arith.constant 2 : index
    %238 = vector.load %arg28[%c24_266, %c2_267] : memref<32x22xf32, #tpu.memory_space<vmem>>, vector<8x16xf32>
    %c24_268 = arith.constant 24 : index
    %c3_269 = arith.constant 3 : index
    %239 = vector.load %arg28[%c24_268, %c3_269] : memref<32x22xf32, #tpu.memory_space<vmem>>, vector<8x16xf32>
    %240 = tpu.concatenate %230, %231, %232, %233, %234, %235, %236, %237, %238, %239 in 0 : vector<8x16xf32>, vector<8x16xf32>, vector<8x16xf32>, vector<8x16xf32>, vector<8x16xf32>, vector<8x16xf32>, vector<8x16xf32>, vector<8x16xf32>, vector<8x16xf32>, vector<8x16xf32> -> vector<80x16xf32>
    %c0_270 = arith.constant 0 : index
    %c0_271 = arith.constant 0 : index
    %241 = vector.load %arg24[%c0_270, %c0_271] : memref<4x80xbf16, #tpu.memory_space<vmem>>, vector<4x80xbf16>
    %242 = arith.truncf %240 : vector<80x16xf32> to vector<80x16xbf16>
    %cst_272 = arith.constant dense<0.000000e+00> : vector<4x16xf32>
    %243 = tpu.matmul %241, %242, %cst_272 {dimension_numbers = #tpu.dot_dimension_numbers<[1], [0], [0], [1], [0, 0, 1, 1], [], []>} : vector<4x80xbf16>, vector<80x16xbf16>, vector<4x16xf32> -> vector<4x16xf32>
    %c0_273 = arith.constant 0 : index
    %c0_274 = arith.constant 0 : index
    %244 = vector.load %arg25[%c0_273, %c0_274] : memref<4x1xf32, #tpu.memory_space<vmem>>, vector<4x1xf32>
    %245 = vector.broadcast %244 : vector<4x1xf32> to vector<4x16xf32>
    %246 = arith.addf %243, %245 : vector<4x16xf32>
    %247 = math.tanh %246 : vector<4x16xf32>
    %c0_275 = arith.constant 0 : index
    %c0_276 = arith.constant 0 : index
    %c0_277 = arith.constant 0 : index
    %248 = vector.load %arg26[%c0_275, %c0_276, %c0_277] : memref<1x4x16xf32, #tpu.memory_space<vmem>>, vector<1x4x16xf32>
    %249 = vector.shape_cast %248 : vector<1x4x16xf32> to vector<4x16xf32>
    %250 = vector.shape_cast %247 : vector<4x16xf32> to vector<1x4x16xf32>
    tpu.vector_store %arg26[%c0_275, %c0_276, %c0_277], %250 {strides = array<i32>} : memref<1x4x16xf32, #tpu.memory_space<vmem>>, vector<1x4x16xf32>,
    return
  }
  func.func @transform_0(%arg0: i32) -> (i32, i32, i32) {
    %c0_i32 = arith.constant 0 : i32
    %c0_i32_0 = arith.constant 0 : i32
    %c0_i32_1 = arith.constant 0 : i32
    return %arg0, %c0_i32, %c0_i32_0 : i32, i32, i32
  }
  func.func @transform_1(%arg0: i32) -> (i32, i32) {
    %c0_i32 = arith.constant 0 : i32
    %c0_i32_0 = arith.constant 0 : i32
    %c0_i32_1 = arith.constant 0 : i32
    return %c0_i32, %c0_i32_0 : i32, i32
  }
  func.func @transform_2(%arg0: i32) -> (i32, i32) {
    %c0_i32 = arith.constant 0 : i32
    %c0_i32_0 = arith.constant 0 : i32
    %c0_i32_1 = arith.constant 0 : i32
    return %c0_i32, %c0_i32_0 : i32, i32
  }
  func.func @transform_3(%arg0: i32) -> (i32, i32) {
    %c0_i32 = arith.constant 0 : i32
    %c0_i32_0 = arith.constant 0 : i32
    %c0_i32_1 = arith.constant 0 : i32
    return %c0_i32, %c0_i32_0 : i32, i32
  }
  func.func @transform_4(%arg0: i32) -> (i32, i32) {
    %c0_i32 = arith.constant 0 : i32
    %c0_i32_0 = arith.constant 0 : i32
    %c0_i32_1 = arith.constant 0 : i32
    return %c0_i32, %c0_i32_0 : i32, i32
  }
  func.func @transform_5(%arg0: i32) -> (i32, i32) {
    %c0_i32 = arith.constant 0 : i32
    %c0_i32_0 = arith.constant 0 : i32
    %c0_i32_1 = arith.constant 0 : i32
    return %c0_i32, %c0_i32_0 : i32, i32
  }
  func.func @transform_6(%arg0: i32) -> (i32, i32) {
    %c0_i32 = arith.constant 0 : i32
    %c0_i32_0 = arith.constant 0 : i32
    %c0_i32_1 = arith.constant 0 : i32
    return %c0_i32, %c0_i32_0 : i32, i32
  }
  func.func @transform_7(%arg0: i32) -> (i32, i32) {
    %c0_i32 = arith.constant 0 : i32
    %c0_i32_0 = arith.constant 0 : i32
    %c0_i32_1 = arith.constant 0 : i32
    return %c0_i32, %c0_i32_0 : i32, i32
  }
  func.func @transform_8(%arg0: i32) -> (i32, i32) {
    %c0_i32 = arith.constant 0 : i32
    %c0_i32_0 = arith.constant 0 : i32
    %c0_i32_1 = arith.constant 0 : i32
    return %c0_i32, %c0_i32_0 : i32, i32
  }
  func.func @transform_9(%arg0: i32) -> (i32, i32) {
    %c0_i32 = arith.constant 0 : i32
    %c0_i32_0 = arith.constant 0 : i32
    %c0_i32_1 = arith.constant 0 : i32
    return %c0_i32, %c0_i32_0 : i32, i32
  }
  func.func @transform_10(%arg0: i32) -> (i32, i32) {
    %c0_i32 = arith.constant 0 : i32
    %c0_i32_0 = arith.constant 0 : i32
    %c0_i32_1 = arith.constant 0 : i32
    return %c0_i32, %c0_i32_0 : i32, i32
  }
  func.func @transform_11(%arg0: i32) -> (i32, i32) {
    %c0_i32 = arith.constant 0 : i32
    %c0_i32_0 = arith.constant 0 : i32
    %c0_i32_1 = arith.constant 0 : i32
    return %c0_i32, %c0_i32_0 : i32, i32
  }
  func.func @transform_12(%arg0: i32) -> (i32, i32) {
    %c0_i32 = arith.constant 0 : i32
    %c0_i32_0 = arith.constant 0 : i32
    %c0_i32_1 = arith.constant 0 : i32
    return %c0_i32, %c0_i32_0 : i32, i32
  }
  func.func @transform_13(%arg0: i32) -> (i32, i32) {
    %c0_i32 = arith.constant 0 : i32
    %c0_i32_0 = arith.constant 0 : i32
    %c0_i32_1 = arith.constant 0 : i32
    return %c0_i32, %c0_i32_0 : i32, i32
  }
  func.func @transform_14(%arg0: i32) -> (i32, i32) {
    %c0_i32 = arith.constant 0 : i32
    %c0_i32_0 = arith.constant 0 : i32
    %c0_i32_1 = arith.constant 0 : i32
    return %c0_i32, %c0_i32_0 : i32, i32
  }
  func.func @transform_15(%arg0: i32) -> (i32, i32) {
    %c0_i32 = arith.constant 0 : i32
    %c0_i32_0 = arith.constant 0 : i32
    %c0_i32_1 = arith.constant 0 : i32
    return %c0_i32, %c0_i32_0 : i32, i32
  }
  func.func @transform_16(%arg0: i32) -> (i32, i32) {
    %c0_i32 = arith.constant 0 : i32
    %c0_i32_0 = arith.constant 0 : i32
    %c0_i32_1 = arith.constant 0 : i32
    return %c0_i32, %c0_i32_0 : i32, i32
  }
  func.func @transform_17(%arg0: i32) -> (i32, i32) {
    %c0_i32 = arith.constant 0 : i32
    %c0_i32_0 = arith.constant 0 : i32
    %c0_i32_1 = arith.constant 0 : i32
    return %c0_i32, %c0_i32_0 : i32, i32
  }
  func.func @transform_18(%arg0: i32) -> (i32, i32) {
    %c0_i32 = arith.constant 0 : i32
    %c0_i32_0 = arith.constant 0 : i32
    %c0_i32_1 = arith.constant 0 : i32
    return %c0_i32, %c0_i32_0 : i32, i32
  }
  func.func @transform_19(%arg0: i32) -> (i32, i32) {
    %c0_i32 = arith.constant 0 : i32
    %c0_i32_0 = arith.constant 0 : i32
    %c0_i32_1 = arith.constant 0 : i32
    return %c0_i32, %c0_i32_0 : i32, i32
  }
  func.func @transform_20(%arg0: i32) -> (i32, i32) {
    %c0_i32 = arith.constant 0 : i32
    %c0_i32_0 = arith.constant 0 : i32
    %c0_i32_1 = arith.constant 0 : i32
    return %c0_i32, %c0_i32_0 : i32, i32
  }
  func.func @transform_21(%arg0: i32) -> (i32, i32) {
    %c0_i32 = arith.constant 0 : i32
    %c0_i32_0 = arith.constant 0 : i32
    %c0_i32_1 = arith.constant 0 : i32
    return %c0_i32, %c0_i32_0 : i32, i32
  }
  func.func @transform_22(%arg0: i32) -> (i32, i32) {
    %c0_i32 = arith.constant 0 : i32
    %c0_i32_0 = arith.constant 0 : i32
    %c0_i32_1 = arith.constant 0 : i32
    return %c0_i32, %c0_i32_0 : i32, i32
  }
  func.func @transform_23(%arg0: i32) -> (i32, i32) {
    %c0_i32 = arith.constant 0 : i32
    %c0_i32_0 = arith.constant 0 : i32
    %c0_i32_1 = arith.constant 0 : i32
    return %c0_i32, %c0_i32_0 : i32, i32
  }
  func.func @transform_24(%arg0: i32) -> (i32, i32) {
    %c0_i32 = arith.constant 0 : i32
    %c0_i32_0 = arith.constant 0 : i32
    %c0_i32_1 = arith.constant 0 : i32
    return %c0_i32, %c0_i32_0 : i32, i32
  }
  func.func @transform_25(%arg0: i32) -> (i32, i32, i32) {
    %c0_i32 = arith.constant 0 : i32
    %c0_i32_0 = arith.constant 0 : i32
    %c0_i32_1 = arith.constant 0 : i32
    return %arg0, %c0_i32, %c0_i32_0 : i32, i32, i32
  }
}

</mosaic_0001>

<bundles_post_ra>
// kernel: vocoder_forward.1
= control target key start
LH: loop header
LB: loop body
LE: loop exit
PB: predicated region body
PF: predicated region fallthrough
CT: control target
= control target key end

     0   :  { %s3404_s29 = smov 0   ;;  %s3961_s0 = inlined_call_operand.vmem [shape: f32[2,8,16], index: 0, kind: input, shape index: {}]   ;;  %s3962_s1 = inlined_call_operand.vmem [shape: bf16[32,56], index: 1, kind: input, shape index: {}]   ;;  %s3963_s2 = inlined_call_operand.vmem [shape: f32[32,1], index: 2, kind: input, shape index: {}]   ;;  %s3964_s3 = inlined_call_operand.vmem [shape: bf16[32,96], index: 3, kind: input, shape index: {}]   ;;  %s3965_s4 = inlined_call_operand.vmem [shape: f32[32,1], index: 4, kind: input, shape index: {}]   ;;  %s3966_s5 = inlined_call_operand.vmem [shape: bf16[32,64], index: 5, kind: input, shape index: {}]   ;;  %s3967_s6 = inlined_call_operand.vmem [shape: f32[32,1], index: 6, kind: input, shape index: {}]   ;;  %s3968_s7 = inlined_call_operand.vmem [shape: bf16[32,64], index: 7, kind: input, shape index: {}]   ;;  %s3969_s8 = inlined_call_operand.vmem [shape: f32[32,1], index: 8, kind: input, shape index: {}]   ;;  %s3970_s9 = inlined_call_operand.vmem [shape: bf16[32,96], index: 9, kind: input, shape index: {}]   ;;  %s3971_s10 = inlined_call_operand.vmem [shape: f32[32,1], index: 10, kind: input, shape index: {}]   ;;  %s3972_s11 = inlined_call_operand.vmem [shape: bf16[32,64], index: 11, kind: input, shape index: {}]   ;;  %s3973_s12 = inlined_call_operand.vmem [shape: f32[32,1], index: 12, kind: input, shape index: {}]   ;;  %s3974_s13 = inlined_call_operand.vmem [shape: bf16[32,64], index: 13, kind: input, shape index: {}]   ;;  %s3975_s14 = inlined_call_operand.vmem [shape: f32[32,1], index: 14, kind: input, shape index: {}]   ;;  %s3976_s15 = inlined_call_operand.vmem [shape: bf16[32,48], index: 15, kind: input, shape index: {}]   ;;  %s3977_s16 = inlined_call_operand.vmem [shape: f32[32,1], index: 16, kind: input, shape index: {}]   ;;  %s3978_s17 = inlined_call_operand.vmem [shape: bf16[32,48], index: 17, kind: input, shape index: {}]   ;;  %s3979_s18 = inlined_call_operand.vmem [shape: f32[32,1], index: 18, kind: input, shape index: {}]   ;;  %s3980_s19 = inlined_call_operand.vmem [shape: bf16[32,80], index: 19, kind: input, shape index: {}]   ;;  %s3981_s20 = inlined_call_operand.vmem [shape: f32[32,1], index: 20, kind: input, shape index: {}]   ;;  %s3982_s21 = inlined_call_operand.vmem [shape: bf16[32,48], index: 21, kind: input, shape index: {}]   ;;  %s3983_s22 = inlined_call_operand.vmem [shape: f32[32,1], index: 22, kind: input, shape index: {}]   ;;  %s3984_s23 = inlined_call_operand.vmem [shape: bf16[4,80], index: 23, kind: input, shape index: {}]   ;;  %s3985_s24 = inlined_call_operand.vmem [shape: f32[4,1], index: 24, kind: input, shape index: {}]   ;;  %s3986_s25 = inlined_call_operand.vmem [shape: f32[2,4,16], index: 25, kind: output, shape index: {}]  }
   0x1   :  { %4015 = sst [smem:[#allocation5_spill]] %s3961_s0 }
   0x2   :  { %4016 = sst [smem:[#allocation6_spill]] %s3962_s1 }
   0x3   :  { %4017 = sst [smem:[#allocation7_spill]] %s3963_s2 }
   0x4   :  { %4018 = sst [smem:[#allocation8_spill]] %s3964_s3 }
   0x5   :  { %4019 = sst [smem:[#allocation9_spill]] %s3965_s4 }
   0x6   :  { %4020 = sst [smem:[#allocation10_spill]] %s3966_s5 }
   0x7   :  { %4021 = sst [smem:[#allocation11_spill]] %s3967_s6 }
   0x8   :  { %4022 = sst [smem:[#allocation12_spill]] %s3968_s7 }
   0x9   :  { %4023 = sst [smem:[#allocation13_spill]] %s3969_s8 }
   0xa   :  { %4024 = sst [smem:[#allocation14_spill]] %s3970_s9 }
   0xb   :  { %4025 = sst [smem:[#allocation15_spill]] %s3986_s25 }
   0xc LB: > { %4026 = sst [smem:[#allocation4_spill]] %s3261_s29  ;;  %s2846_s2 = sadd.s32 4294967295, %s3261_s29   ;;  %s3261_s29 = sphi %s3404_s29, %s35_s29  }
   0xd   : > { %p2850_p0 = scmp.ge.s32.totalorder %s3261_s29, 1  ;;  %p686_p1 = scmp.lt.s32.totalorder %s3261_s29, 3 }
   0xf   : > { %p687_p2 = pnand %p2850_p0, %p686_p1 }
  0x10   : > { %p752_p3 = scmp.lt.s32.totalorder (!%p687_p2), %s2846_s2, 1  ;;  %s4027_s3 = sld [smem:[#allocation5_spill]] (!%p687_p2) }
  0x11   : > { %690 = sbr.rel (%p687_p2) target bundleno = 6870 (0x1ad6), region = 120  ;;  %s4000_s1 = smov (!%p687_p2), 3  }
  0x12   : > { %s3265_s8 = smov (!%p687_p2), 124   ;;  %s3266_s27 = smov (!%p687_p2), 122  }
  0x13   : > { %s4028_s9 = sld [smem:[#allocation6_spill]] (!%p687_p2)  ;;  %s3267_s5 = smov (!%p687_p2), 123  }
  0x14   : > { %s4002_s0 = smov (!%p687_p2), 126   ;;  %s3998_s30 = smov (!%p687_p2), 127  }
  0x15   : > { %s4032_s4 = smov (!%p687_p2), 3   ;;  %s4004_s28 = smov (!%p687_p2), 1  }
  0x16   : > { %vm761_vm0 = vcmask 23552   ;;  %vm766_vm1 = vcmask 179352   ;;  %v3263_v0 = vmov 0.0   ;;  %s4045_s2 = smov (!%p752_p3, %s2846_s2), 1  ;;  %vm776_vm2 = vcmask 154648   ;;  %s4034_s7 = smov 127  }
  0x17   : > { %762 = vst.msk [vmem:[#allocation3] sm:$0xff] %vm761_vm0, %v3263_v0  ;;  %763 = vst.msk [vmem:[#allocation3 + $0x8] sm:$0xff] %vm761_vm0, %v3263_v0  ;;  %s2851_s6 = sshll.u32 %s4045_s2, 3  ;;  %vm840_vm3 = vcmask 457728   ;;  %v3269_v5 = vmov 0   ;;  %vm847_vm4 = vcmask 1043456  }
  0x18   : > { %764 = vst.msk [vmem:[#allocation3 + $0x10] sm:$0xff] %vm761_vm0, %v3263_v0  ;;  %765 = vst.msk [vmem:[#allocation3 + $0x18] sm:$0xff] %vm761_vm0, %v3263_v0  ;;  %s755_s26 = scalar_lea.vmem %s4027_s3, %s2851_s6  ;;  %3144 = vset.pattern.permute.xlu1 %v3269_v5  ;;  %3145 = vset.pattern.permute.xlu0 %v3269_v5  ;;  %s3996_s6 = smov 125   ;;  %vm1032_vm9 = vcmask 785408   ;;  %vm1088_vm10 = vcmask 130048   ;;  %vm1207_vm15 = vcmask 523264  }
  0x19   : > { %767 = vst.msk [vmem:[#allocation3] sm:$0xff] %vm766_vm1, %v3263_v0  ;;  %768 = vst.msk [vmem:[#allocation3 + $0x8] sm:$0xff] %vm766_vm1, %v3263_v0  ;;  %v771_v1 = vld [vmem:[%s755_s26] sm:$0xff]  ;;  %s4029_s26 = sld [smem:[#allocation7_spill]]  ;;  %v3232_v21 = vld [vmem:[%s4028_s9 + $0x8] sm:$0xff]   ;;  %s4040_s29 = smov 126  }
  0x1a   : > { %769 = vst.msk [vmem:[#allocation3 + $0x10] sm:$0xff] %vm766_vm1, %v3263_v0  ;;  %770 = vst.msk [vmem:[#allocation3 + $0x18] sm:$0xff] %vm766_vm1, %v3263_v0  ;;  %773 = vrot.lane.b32.xlu0 %v771_v1, %s4000_s1  ;;  %v3231_v4 = vld [vmem:[%s4028_s9] sm:$0xff]   ;;  %s4037_s9 = smov 1  }
  0x1b   : > { %2982 = vmatprep.mubr.msk.bf16.mxu1 %vm840_vm3, %v3231_v4 }
  0x1f   : > { %v808_v6 = vld [vmem:[%s4029_s26 + $0x10] sm:$0xff]  ;;  %v809_v7 = vld [vmem:[%s4029_s26 + $0x18] sm:$0xff]  ;;  %v806_v8 = vld [vmem:[%s4029_s26] sm:$0xff] }
  0x20   : > { %v807_v9 = vld [vmem:[%s4029_s26 + $0x8] sm:$0xff] }
  0x8c   : > { %v774_v2 = vpop.permute.xlu0 %773 }
  0x8d   : > { %777 = vst.msk [vmem:[#allocation3] sm:$0xff] %vm776_vm2, %v774_v2 }
  0x94   : > { %v778_v3 = vld [vmem:[#allocation3] sm:$0xff] }
  0x95   : > { %789 = vrot.lane.b32.xlu1 %v778_v3, %s3265_s8  ;;  %795 = vrot.lane.b32.xlu0 %v778_v3, %s3266_s27  ;;  %s4030_s27 = sld [smem:[#allocation8_spill]] }
  0x96   : > { %s4036_s8 = sld [smem:[#allocation11_spill]] }
  0x99   : > { %792 = vrot.lane.b32.xlu1 %v778_v3, %s3267_s5  ;;  %783 = vrot.lane.b32.xlu0 %v778_v3, %s4002_s0  ;;  %s4031_s5 = sld [smem:[#allocation9_spill]] }
  0x9d   : > { %786 = vrot.lane.b32.xlu1 %v778_v3, %s3996_s6  ;;  %780 = vrot.lane.b32.xlu0 %v778_v3, %s3998_s30  ;;  %s4033_s6 = smov 125  }
  0xa1   : > { %822 = vperm.xlu1 %3144, %v808_v6   ;;  %827 = vperm.xlu0 %3145, %v809_v7   ;;  %v3233_v6 = vld [vmem:[%s4030_s27] sm:$0xff]   ;;  %v976_v7 = vld [vmem:[%s4031_s5 + $0x10] sm:$0xff] }
  0xa5   : > { %812 = vperm.xlu1 %3144, %v806_v8  }
  0xa9   : > { %817 = vperm.xlu1 %3144, %v807_v9   ;;  %v977_v9 = vld [vmem:[%s4031_s5 + $0x18] sm:$0xff] }
 0x107   : > { %v790_v10 = vpop.permute.xlu1 %789  ;;  %v796_v11 = vpop.permute.xlu0 %795 }
 0x108   : > { %v805_v12 = vpack.c.bf16 %v796_v11, %v796_v11  ;;  %v975_v11 = vld [vmem:[%s4031_s5 + $0x8] sm:$0xff] }
 0x10a   : > { %3124 = vmatprep.subr.msk.bf16.mxu1 %vm847_vm4, %v805_v12  ;;  %v849_v13 = vsel %vm847_vm4, %v805_v12, 0 }
 0x10b   : > { %v793_v14 = vpop.permute.xlu1 %792  ;;  %2975 = vmatpush3.bf16.msra.mxu1 %v849_v13  ;;  %v784_v15 = vpop.permute.xlu0 %783 }
 0x10c   : > { %v804_v16 = vpack.c.bf16 %v793_v14, %v790_v10  ;;  %v974_v10 = vld [vmem:[%s4031_s5] sm:$0xff]  ;;  %s4038_s5 = sld [smem:[#allocation12_spill]] }
 0x10e   : > { %2976 = vmatprep.subr.bf16.mxu1 %v804_v16 }
 0x10f   : > { %v787_v17 = vpop.permute.xlu1 %786  ;;  %2977 = vmatpush3.bf16.msra.mxu1 %v804_v16  ;;  %v781_v18 = vpop.permute.xlu0 %780 }
 0x110   : > { %v803_v19 = vpack.c.bf16 %v787_v17, %v784_v15  ;;  %v802_v20 = vpack.c.bf16 %v781_v18, %v778_v3  ;;  %v3234_v18 = vld [vmem:[%s4030_s27 + $0x8] sm:$0xff]  }
 0x112   : > { %2978 = vmatprep.subr.bf16.mxu1 %v803_v19 }
 0x113   : > { %2979 = vmatpush3.bf16.msra.mxu1 %v803_v19 }
 0x114   : > { %2980 = vmatprep.subr.bf16.mxu1 %v802_v20 }
 0x117   : > { %2981 = vmatpush3.bf16.msra.mxu1 %v802_v20 }
 0x11a   : > { %2983 = vmatmul.mubr.msk.bf16.vlgmr.msra.gmra.mxu1 %vm840_vm3, %v3232_v21 }
 0x11b   : > { %2998 = vmatprep.mubr.msk.bf16.mxu1 %vm1032_vm9, %v3233_v6 }
 0x11c   : > { %v823_v22 = vpop.permute.xlu1 %822  ;;  %v828_v27 = vpop.permute.xlu0 %827 }
 0x120   : > { %v813_v23 = vpop.permute.xlu1 %812 }
 0x124   : > { %v818_v34 = vpop.permute.xlu1 %817 }
 0x1da   : > { %v2984_v24 = vpop.f32.mrf.mxu1 }
 0x1db   : > { %v894_v25 = vadd.f32 %v2984_v24, %v823_v22 }
 0x1dc   : > { %v885_v26 = vpop.f32.mrf.mxu1 }
 0x1dd   : > { %v906_v28 = vmul.f32 0.1, %v894_v25  ;;  %v886_v29 = vadd.f32 %v885_v26, %v813_v23  ;;  %vm902_vm5 = vcmp.ge.f32.partialorder %v894_v25, 0.0 }
 0x1de   : > { %v2985_v30 = vpop.f32.mrf.mxu1 }
 0x1df   : > { %v904_v31 = vmul.f32 0.1, %v886_v29  ;;  %v897_v32 = vadd.f32 %v2985_v30, %v828_v27  ;;  %v910_v33 = vsel %vm902_vm5, %v894_v25, %v906_v28  ;;  %vm900_vm6 = vcmp.ge.f32.partialorder %v886_v29, 0.0 }
 0x1e0   : > { %920 = vrot.lane.b32.xlu0 %v910_v33, %s4000_s1  ;;  %v888_v35 = vpop.f32.mrf.mxu1 }
 0x1e1   : > { %v889_v36 = vadd.f32 %v888_v35, %v818_v34  ;;  %vm903_vm7 = vcmp.ge.f32.partialorder %v897_v32, 0.0  ;;  %v907_v37 = vmul.f32 0.1, %v897_v32  ;;  %v908_v39 = vsel %vm900_vm6, %v886_v29, %v904_v31 }
 0x1e3   : > { %v905_v38 = vmul.f32 0.1, %v889_v36  ;;  %v911_v40 = vsel %vm903_vm7, %v897_v32, %v907_v37  ;;  %vm901_vm8 = vcmp.ge.f32.partialorder %v889_v36, 0.0 }
 0x1e4   : > { %916 = vrot.lane.b32.xlu0 %v908_v39, %s4000_s1  ;;  %922 = vrot.lane.b32.xlu1 %v911_v40, %s4000_s1 }
 0x1e5   : > { %v909_v41 = vsel %vm901_vm8, %v889_v36, %v905_v38 }
 0x1e8   : > { %918 = vrot.lane.b32.xlu1 %v909_v41, %s4000_s1  ;;  %s4035_s1 = sld [smem:[#allocation10_spill]] }
 0x252   : > { %v921_v42 = vpop.permute.xlu0 %920 }
 0x253   : > { %930 = vst.msk [vmem:[#allocation3 + $0x10] sm:$0xff] %vm776_vm2, %v921_v42 }
 0x256   : > { %v923_v43 = vpop.permute.xlu1 %922  ;;  %v917_v44 = vpop.permute.xlu0 %916 }
 0x257   : > { %931 = vst.msk [vmem:[#allocation3 + $0x18] sm:$0xff] %vm776_vm2, %v923_v43  ;;  %928 = vst.msk [vmem:[#allocation3] sm:$0xff] %vm776_vm2, %v917_v44 }
 0x25a   : > { %v919_v45 = vpop.permute.xlu1 %918  ;;  %v934_v46 = vld [vmem:[#allocation3 + $0x10] sm:$0xff] }
 0x25b   : > { %929 = vst.msk [vmem:[#allocation3 + $0x8] sm:$0xff] %vm776_vm2, %v919_v45 }
 0x25e   : > { %v935_v47 = vld [vmem:[#allocation3 + $0x18] sm:$0xff]  ;;  %v932_v49 = vld [vmem:[#allocation3] sm:$0xff] }
 0x25f   : > { %v3146_v48 = vpack.i.bf16 %v935_v47, %v934_v46  ;;  %v969_v5 = vpack.c.bf16 %v935_v47, %v934_v46 }
 0x261   : > { %3147 = vrot.lane.b32.xlu0 %v3146_v48, %s4002_s0 }
 0x262   : > { %v933_v50 = vld [vmem:[#allocation3 + $0x8] sm:$0xff] }
 0x263   : > { %v3151_v51 = vpack.i.bf16 %v933_v50, %v932_v49  ;;  %v968_v8 = vpack.c.bf16 %v933_v50, %v932_v49 }
 0x265   : > { %3157 = vrot.lane.b32.xlu0 %v3146_v48, %s3998_s30  ;;  %3152 = vrot.lane.b32.xlu1 %v3151_v51, %s4002_s0 }
 0x269   : > { %3162 = vrot.lane.b32.xlu1 %v3151_v51, %s3998_s30  ;;  %s4042_s30 = sld [smem:[#allocation15_spill]] }
 0x2d3   : > { %v3148_v52 = vpop.permute.xlu0 %3147 }
 0x2d4   : > { %v3150_v53 = vunpack.i.h.bf16 %v3148_v52  ;;  %v3149_v54 = vunpack.i.l.bf16 %v3148_v52 }
 0x2d6   : > { %v973_v55 = vpack.c.bf16 %v3150_v53, %v3149_v54 }
 0x2d7   : > { %v3153_v56 = vpop.permute.xlu1 %3152  ;;  %v3158_v57 = vpop.permute.xlu0 %3157 }
 0x2d8   : > { %v3155_v58 = vunpack.i.h.bf16 %v3153_v56  ;;  %v3154_v59 = vunpack.i.l.bf16 %v3153_v56  ;;  %v3160_v60 = vunpack.i.h.bf16 %v3158_v57  ;;  %v3159_v61 = vunpack.i.l.bf16 %v3158_v57  ;;  %1024 = vrot.lane.b32.xlu0 %v973_v55, %s4002_s0  ;;  %v3235_v57 = vld [vmem:[%s4035_s1] sm:$0xff]  }
 0x2d9   : > { %3010 = vmatprep.mubr.msk.bf16.mxu0 %vm1207_vm15, %v3235_v57 }
 0x2da   : > { %v972_v62 = vpack.c.bf16 %v3155_v58, %v3154_v59  ;;  %v971_v63 = vpack.c.bf16 %v3160_v60, %v3159_v61 }
 0x2db   : > { %v3163_v1 = vpop.permute.xlu1 %3162 }
 0x2dc   : > { %v3165_v2 = vunpack.i.h.bf16 %v3163_v1  ;;  %v3164_v3 = vunpack.i.l.bf16 %v3163_v1  ;;  %1022 = vrot.lane.b32.xlu1 %v972_v62, %s4002_s0  ;;  %1020 = vrot.lane.b32.xlu0 %v971_v63, %s4002_s0 }
 0x2de   : > { %v970_v4 = vpack.c.bf16 %v3165_v2, %v3164_v3  ;;  %v1159_v2 = vld [vmem:[%s4036_s8 + $0x10] sm:$0xff]  ;;  %v1160_v3 = vld [vmem:[%s4036_s8 + $0x18] sm:$0xff] }
 0x2e0   : > { %1018 = vrot.lane.b32.xlu1 %v970_v4, %s4002_s0  ;;  %1016 = vrot.lane.b32.xlu0 %v969_v5, %s4002_s0  ;;  %v1157_v4 = vld [vmem:[%s4036_s8] sm:$0xff]  ;;  %v1158_v5 = vld [vmem:[%s4036_s8 + $0x8] sm:$0xff]  ;;  %s2852_s8 = sshll.u32 %s4045_s2, 2 }
 0x2e1   : > { %s759_s3 = scalar_lea.vmem %s4042_s30, %s2852_s8 }
 0x2e4   : > { %1014 = vrot.lane.b32.xlu1 %v968_v8, %s4002_s0  ;;  %990 = vperm.xlu0 %3145, %v976_v7   ;;  %s4039_s0 = sld [smem:[#allocation13_spill]] }
 0x2e8   : > { %995 = vperm.xlu1 %3144, %v977_v9   ;;  %980 = vperm.xlu0 %3145, %v974_v10   ;;  %v3236_v9 = vld [vmem:[%s4035_s1 + $0x8] sm:$0xff]  }
 0x2ea   : > { %v1326_v57 = vld [vmem:[%s4039_s0 + $0x18] sm:$0xff] }
 0x2ec   : > { %985 = vperm.xlu1 %3144, %v975_v11  }
 0x34a   : > { %v1025_v12 = vpop.permute.xlu0 %1024 }
 0x34b   : > { %2986 = vmatprep.subr.bf16.mxu1 %v1025_v12 }
 0x34c   : > { %2987 = vmatpush3.bf16.msra.mxu1 %v1025_v12 }
 0x34e   : > { %v1023_v13 = vpop.permute.xlu1 %1022  ;;  %v1021_v14 = vpop.permute.xlu0 %1020 }
 0x34f   : > { %2988 = vmatprep.subr.bf16.mxu1 %v1023_v13 }
 0x350   : > { %2989 = vmatpush3.bf16.msra.mxu1 %v1023_v13 }
 0x351   : > { %2990 = vmatprep.subr.bf16.mxu1 %v1021_v14 }
 0x352   : > { %v1019_v15 = vpop.permute.xlu1 %1018  ;;  %v1017_v16 = vpop.permute.xlu0 %1016 }
 0x354   : > { %2991 = vmatpush3.bf16.msra.mxu1 %v1021_v14 }
 0x355   : > { %2992 = vmatprep.subr.bf16.mxu1 %v1019_v15 }
 0x356   : > { %v1015_v17 = vpop.permute.xlu1 %1014 }
 0x358   : > { %2993 = vmatpush3.bf16.msra.mxu1 %v1019_v15 }
 0x359   : > { %2994 = vmatprep.subr.bf16.mxu1 %v1017_v16 }
 0x35c   : > { %2995 = vmatpush3.bf16.msra.mxu1 %v1017_v16 }
 0x35d   : > { %2996 = vmatprep.subr.bf16.mxu1 %v1015_v17 }
 0x35f   : > { %v991_v19 = vpop.permute.xlu0 %990 }
 0x360   : > { %2997 = vmatpush3.bf16.msra.mxu1 %v1015_v17 }
 0x363   : > { %2999 = vmatmul.mubr.msk.bf16.vlgmr.msra.gmra.mxu1 %vm1032_vm9, %v3234_v18  ;;  %v996_v20 = vpop.permute.xlu1 %995  ;;  %v981_v23 = vpop.permute.xlu0 %980 }
 0x367   : > { %v986_v28 = vpop.permute.xlu1 %985 }
 0x423   : > { %v3000_v21 = vpop.f32.mrf.mxu1 }
 0x424   : > { %v1082_v22 = vadd.f32 %v3000_v21, %v991_v19 }
 0x425   : > { %v1073_v24 = vpop.f32.mrf.mxu1 }
 0x426   : > { %1091 = vst.msk [vmem:[#allocation2 + $0x10] sm:$0xff] %vm1088_vm10, %v1082_v22  ;;  %v1074_v25 = vadd.f32 %v1073_v24, %v981_v23 }
 0x427   : > { %v3001_v26 = vpop.f32.mrf.mxu1 }
 0x428   : > { %1089 = vst.msk [vmem:[#allocation2] sm:$0xff] %vm1088_vm10, %v1074_v25  ;;  %v1085_v27 = vadd.f32 %v3001_v26, %v996_v20 }
 0x429   : > { %v1076_v29 = vpop.f32.mrf.mxu1 }
 0x42a   : > { %1092 = vst.msk [vmem:[#allocation2 + $0x18] sm:$0xff] %vm1088_vm10, %v1085_v27  ;;  %v1077_v30 = vadd.f32 %v1076_v29, %v986_v28 }
 0x42c   : > { %1090 = vst.msk [vmem:[#allocation2 + $0x8] sm:$0xff] %vm1088_vm10, %v1077_v30 }
 0x42d   : > { %v3493_v31 = vld [vmem:[#allocation2 + $0x10] sm:$0xff] }
 0x42e   : > { %vm1099_vm11 = vcmp.ge.f32.partialorder %v3493_v31, 0.0  ;;  %v1103_v32 = vmul.f32 0.1, %v3493_v31 }
 0x42f   : > { %v3497_v33 = vld [vmem:[#allocation2] sm:$0xff] }
 0x430   : > { %v1107_v34 = vsel %vm1099_vm11, %v3493_v31, %v1103_v32  ;;  %v1101_v35 = vmul.f32 0.1, %v3497_v33  ;;  %vm1097_vm12 = vcmp.ge.f32.partialorder %v3497_v33, 0.0 }
 0x431   : > { %1117 = vrot.lane.b32.xlu0 %v1107_v34, %s4032_s4  ;;  %v3502_v36 = vld [vmem:[#allocation2 + $0x18] sm:$0xff] }
 0x432   : > { %vm1100_vm13 = vcmp.ge.f32.partialorder %v3502_v36, 0.0  ;;  %v1104_v37 = vmul.f32 0.1, %v3502_v36  ;;  %v1105_v40 = vsel %vm1097_vm12, %v3497_v33, %v1101_v35 }
 0x433   : > { %v3507_v38 = vld [vmem:[#allocation2 + $0x8] sm:$0xff] }
 0x434   : > { %v1108_v39 = vsel %vm1100_vm13, %v3502_v36, %v1104_v37  ;;  %v1102_v41 = vmul.f32 0.1, %v3507_v38  ;;  %vm1098_vm14 = vcmp.ge.f32.partialorder %v3507_v38, 0.0 }
 0x435   : > { %1119 = vrot.lane.b32.xlu1 %v1108_v39, %s4032_s4  ;;  %1113 = vrot.lane.b32.xlu0 %v1105_v40, %s4032_s4 }
 0x436   : > { %v1106_v42 = vsel %vm1098_vm14, %v3507_v38, %v1102_v41 }
 0x439   : > { %1115 = vrot.lane.b32.xlu1 %v1106_v42, %s4032_s4 }
 0x4a3   : > { %v1118_v43 = vpop.permute.xlu0 %1117 }
 0x4a4   : > { %1127 = vst.msk [vmem:[#allocation3 + $0x10] sm:$0xff] %vm776_vm2, %v1118_v43 }
 0x4a7   : > { %v1120_v44 = vpop.permute.xlu1 %1119  ;;  %v1114_v45 = vpop.permute.xlu0 %1113 }
 0x4a8   : > { %1128 = vst.msk [vmem:[#allocation3 + $0x18] sm:$0xff] %vm776_vm2, %v1120_v44  ;;  %1125 = vst.msk [vmem:[#allocation3] sm:$0xff] %vm776_vm2, %v1114_v45 }
 0x4ab   : > { %v1116_v46 = vpop.permute.xlu1 %1115  ;;  %v1131_v47 = vld [vmem:[#allocation3 + $0x10] sm:$0xff] }
 0x4ac   : > { %1126 = vst.msk [vmem:[#allocation3 + $0x8] sm:$0xff] %vm776_vm2, %v1116_v46 }
 0x4af   : > { %v1132_v48 = vld [vmem:[#allocation3 + $0x18] sm:$0xff]  ;;  %v1129_v50 = vld [vmem:[#allocation3] sm:$0xff] }
 0x4b0   : > { %v3166_v49 = vpack.i.bf16 %v1132_v48, %v1131_v47  ;;  %v1156_v52 = vpack.c.bf16 %v1132_v48, %v1131_v47  ;;  %v3237_v48 = vld [vmem:[%s4038_s5] sm:$0xff]  }
 0x4b1   : > { %3022 = vmatprep.mubr.msk.bf16.mxu1 %vm1207_vm15, %v3237_v48 }
 0x4b2   : > { %3167 = vrot.lane.b32.xlu0 %v3166_v49, %s4004_s28  ;;  %s4041_s28 = sld [smem:[#allocation14_spill]] }
 0x4b3   : > { %v1130_v51 = vld [vmem:[#allocation3 + $0x8] sm:$0xff] }
 0x4b4   : > { %v3171_v53 = vpack.i.bf16 %v1130_v51, %v1129_v50  ;;  %v1153_v1 = vpack.c.bf16 %v1130_v51, %v1129_v50 }
 0x4b6   : > { %1201 = vrot.lane.b32.xlu0 %v1156_v52, %s4033_s6  ;;  %3172 = vrot.lane.b32.xlu1 %v3171_v53, %s4034_s7 }
 0x524   : > { %v3168_v54 = vpop.permute.xlu0 %3167 }
 0x525   : > { %v3170_v55 = vunpack.i.h.bf16 %v3168_v54  ;;  %v3169_v56 = vunpack.i.l.bf16 %v3168_v54 }
 0x527   : > { %v1155_v58 = vpack.c.bf16 %v3170_v55, %v3169_v56  ;;  %v1325_v56 = vld [vmem:[%s4039_s0 + $0x10] sm:$0xff] }
 0x528   : > { %v3173_v59 = vpop.permute.xlu1 %3172  ;;  %v1202_v60 = vpop.permute.xlu0 %1201 }
 0x529   : > { %v3175_v61 = vunpack.i.h.bf16 %v3173_v59  ;;  %v3174_v62 = vunpack.i.l.bf16 %v3173_v59  ;;  %3002 = vmatprep.subr.bf16.mxu0 %v1202_v60  ;;  %1199 = vrot.lane.b32.xlu1 %v1155_v58, %s4033_s6  ;;  %v1323_v58 = vld [vmem:[%s4039_s0] sm:$0xff]  ;;  %v1324_v59 = vld [vmem:[%s4039_s0 + $0x8] sm:$0xff] }
 0x52a   : > { %3003 = vmatpush3.bf16.msra.mxu0 %v1202_v60 }
 0x52b   : > { %v1154_v63 = vpack.c.bf16 %v3175_v61, %v3174_v62 }
 0x52d   : > { %1197 = vrot.lane.b32.xlu0 %v1154_v63, %s4033_s6  ;;  %1195 = vrot.lane.b32.xlu1 %v1153_v1, %s4033_s6  ;;  %v3238_v63 = vld [vmem:[%s4038_s5 + $0x8] sm:$0xff]  }
 0x531   : > { %1173 = vperm.xlu0 %3145, %v1159_v2   ;;  %1178 = vperm.xlu1 %3144, %v1160_v3  }
 0x535   : > { %1163 = vperm.xlu0 %3145, %v1157_v4   ;;  %1168 = vperm.xlu1 %3144, %v1158_v5  }
 0x59b   : > { %v1200_v6 = vpop.permute.xlu1 %1199 }
 0x59c   : > { %3004 = vmatprep.subr.bf16.mxu0 %v1200_v6 }
 0x59d   : > { %3005 = vmatpush3.bf16.msra.mxu0 %v1200_v6 }
 0x59f   : > { %v1198_v7 = vpop.permute.xlu0 %1197  ;;  %v1196_v8 = vpop.permute.xlu1 %1195 }
 0x5a0   : > { %3006 = vmatprep.subr.bf16.mxu0 %v1198_v7 }
 0x5a1   : > { %3007 = vmatpush3.bf16.msra.mxu0 %v1198_v7 }
 0x5a2   : > { %3008 = vmatprep.subr.bf16.mxu0 %v1196_v8 }
 0x5a5   : > { %3009 = vmatpush3.bf16.msra.mxu0 %v1196_v8 }
 0x5a8   : > { %3011 = vmatmul.mubr.msk.bf16.vlgmr.msra.gmra.mxu0 %vm1207_vm15, %v3236_v9 }
 0x5ac   : > { %v1174_v10 = vpop.permute.xlu0 %1173  ;;  %v1179_v11 = vpop.permute.xlu1 %1178 }
 0x5b0   : > { %v1164_v14 = vpop.permute.xlu0 %1163  ;;  %v1169_v22 = vpop.permute.xlu1 %1168 }
 0x668   : > { %v3012_v12 = vpop.f32.mrf.mxu0 }
 0x669   : > { %v1257_v13 = vadd.f32 %v3012_v12, %v1174_v10 }
 0x66a   : > { %v1248_v15 = vpop.f32.mrf.mxu0 }
 0x66b   : > { %v1269_v16 = vmul.f32 0.1, %v1257_v13  ;;  %v1249_v17 = vadd.f32 %v1248_v15, %v1164_v14  ;;  %vm1265_vm0 = vcmp.ge.f32.partialorder %v1257_v13, 0.0 }
 0x66c   : > { %v3013_v18 = vpop.f32.mrf.mxu0 }
 0x66d   : > { %v1267_v19 = vmul.f32 0.1, %v1249_v17  ;;  %v1260_v20 = vadd.f32 %v3013_v18, %v1179_v11  ;;  %v1273_v21 = vsel %vm1265_vm0, %v1257_v13, %v1269_v16  ;;  %vm1263_vm1 = vcmp.ge.f32.partialorder %v1249_v17, 0.0 }
 0x66e   : > { %1283 = vrot.lane.b32.xlu0 %v1273_v21, %s4032_s4  ;;  %v1251_v23 = vpop.f32.mrf.mxu0 }
 0x66f   : > { %v1270_v24 = vmul.f32 0.1, %v1260_v20  ;;  %v1252_v25 = vadd.f32 %v1251_v23, %v1169_v22  ;;  %vm1266_vm3 = vcmp.ge.f32.partialorder %v1260_v20, 0.0  ;;  %v1271_v27 = vsel %vm1263_vm1, %v1249_v17, %v1267_v19 }
 0x671   : > { %v1268_v26 = vmul.f32 0.1, %v1252_v25  ;;  %v1274_v28 = vsel %vm1266_vm3, %v1260_v20, %v1270_v24  ;;  %vm1264_vm4 = vcmp.ge.f32.partialorder %v1252_v25, 0.0 }
 0x672   : > { %1279 = vrot.lane.b32.xlu0 %v1271_v27, %s4032_s4  ;;  %1285 = vrot.lane.b32.xlu1 %v1274_v28, %s4032_s4 }
 0x673   : > { %v1272_v29 = vsel %vm1264_vm4, %v1252_v25, %v1268_v26 }
 0x676   : > { %1281 = vrot.lane.b32.xlu1 %v1272_v29, %s4032_s4 }
 0x6e0   : > { %v1284_v30 = vpop.permute.xlu0 %1283 }
 0x6e1   : > { %1293 = vst.msk [vmem:[#allocation3 + $0x10] sm:$0xff] %vm776_vm2, %v1284_v30 }
 0x6e4   : > { %v1280_v32 = vpop.permute.xlu0 %1279  ;;  %v1286_v34 = vpop.permute.xlu1 %1285 }
 0x6e5   : > { %1291 = vst.msk [vmem:[#allocation3] sm:$0xff] %vm776_vm2, %v1280_v32  ;;  %1294 = vst.msk [vmem:[#allocation3 + $0x18] sm:$0xff] %vm776_vm2, %v1286_v34 }
 0x6e8   : > { %v1282_v35 = vpop.permute.xlu1 %1281  ;;  %v1297_v37 = vld [vmem:[#allocation3 + $0x10] sm:$0xff] }
 0x6e9   : > { %1292 = vst.msk [vmem:[#allocation3 + $0x8] sm:$0xff] %vm776_vm2, %v1282_v35 }
 0x6ec   : > { %v1298_v39 = vld [vmem:[#allocation3 + $0x18] sm:$0xff]  ;;  %v1295_v41 = vld [vmem:[#allocation3] sm:$0xff] }
 0x6ed   : > { %v3176_v40 = vpack.i.bf16 %v1298_v39, %v1297_v37  ;;  %v1322_v43 = vpack.c.bf16 %v1298_v39, %v1297_v37 }
 0x6ef   : > { %3177 = vrot.lane.b32.xlu0 %v3176_v40, %s4037_s9 }
 0x6f0   : > { %v1296_v42 = vld [vmem:[#allocation3 + $0x8] sm:$0xff] }
 0x6f1   : > { %v3181_v44 = vpack.i.bf16 %v1296_v42, %v1295_v41  ;;  %v1319_v55 = vpack.c.bf16 %v1296_v42, %v1295_v41 }
 0x6f3   : > { %1367 = vrot.lane.b32.xlu0 %v1322_v43, %s4033_s6  ;;  %3182 = vrot.lane.b32.xlu1 %v3181_v44, %s4034_s7 }
 0x761   : > { %v3178_v45 = vpop.permute.xlu0 %3177 }
 0x762   : > { %v3180_v46 = vunpack.i.h.bf16 %v3178_v45  ;;  %v3179_v47 = vunpack.i.l.bf16 %v3178_v45 }
 0x764   : > { %v1321_v49 = vpack.c.bf16 %v3180_v46, %v3179_v47 }
 0x765   : > { %v1368_v50 = vpop.permute.xlu0 %1367  ;;  %v3183_v51 = vpop.permute.xlu1 %3182 }
 0x766   : > { %v3185_v52 = vunpack.i.h.bf16 %v3183_v51  ;;  %v3184_v53 = vunpack.i.l.bf16 %v3183_v51  ;;  %3014 = vmatprep.subr.bf16.mxu1 %v1368_v50  ;;  %1365 = vrot.lane.b32.xlu1 %v1321_v49, %s4033_s6 }
 0x767   : > { %3015 = vmatpush3.bf16.msra.mxu1 %v1368_v50 }
 0x768   : > { %v1320_v54 = vpack.c.bf16 %v3185_v52, %v3184_v53 }
 0x76a   : > { %1363 = vrot.lane.b32.xlu0 %v1320_v54, %s4033_s6  ;;  %1361 = vrot.lane.b32.xlu1 %v1319_v55, %s4033_s6 }
 0x76e   : > { %1339 = vperm.xlu0 %3145, %v1325_v56   ;;  %1344 = vperm.xlu1 %3144, %v1326_v57  }
 0x772   : > { %1329 = vperm.xlu0 %3145, %v1323_v58   ;;  %1334 = vperm.xlu1 %3144, %v1324_v59  }
 0x7d8   : > { %v1366_v60 = vpop.permute.xlu1 %1365 }
 0x7d9   : > { %3016 = vmatprep.subr.bf16.mxu1 %v1366_v60 }
 0x7da   : > { %3017 = vmatpush3.bf16.msra.mxu1 %v1366_v60  ;;  %v3239_v60 = vld [vmem:[%s4041_s28] sm:$0xff]  }
 0x7db   : > { %3038 = vmatprep.mubr.msk.bf16.mxu0 %vm1032_vm9, %v3239_v60 }
 0x7dc   : > { %v1364_v61 = vpop.permute.xlu0 %1363  ;;  %v1362_v62 = vpop.permute.xlu1 %1361 }
 0x7dd   : > { %3018 = vmatprep.subr.bf16.mxu1 %v1364_v61 }
 0x7de   : > { %3019 = vmatpush3.bf16.msra.mxu1 %v1364_v61  ;;  %v1526_v61 = vld [vmem:[%s3971_s10 + $0x10] sm:$0xff] }
 0x7df   : > { %3020 = vmatprep.subr.bf16.mxu1 %v1362_v62 }
 0x7e2   : > { %3021 = vmatpush3.bf16.msra.mxu1 %v1362_v62  ;;  %v1527_v62 = vld [vmem:[%s3971_s10 + $0x18] sm:$0xff] }
 0x7e5   : > { %3023 = vmatmul.mubr.msk.bf16.vlgmr.msra.gmra.mxu1 %vm1207_vm15, %v3238_v63  ;;  %v1524_v63 = vld [vmem:[%s3971_s10] sm:$0xff] }
 0x7e9   : > { %v1340_v1 = vpop.permute.xlu0 %1339  ;;  %v1345_v2 = vpop.permute.xlu1 %1344 }
 0x7ed   : > { %v1330_v5 = vpop.permute.xlu0 %1329  ;;  %v1335_v12 = vpop.permute.xlu1 %1334 }
 0x8a5   : > { %v3024_v3 = vpop.f32.mrf.mxu1 }
 0x8a6   : > { %v1422_v4 = vadd.f32 %v3024_v3, %v1340_v1  ;;  %v1525_v1 = vld [vmem:[%s3971_s10 + $0x8] sm:$0xff] }
 0x8a7   : > { %v1413_v6 = vpop.f32.mrf.mxu1 }
 0x8a8   : > { %v1434_v7 = vadd.f32 %v1422_v4, %v3493_v31  ;;  %v1414_v8 = vadd.f32 %v1413_v6, %v1330_v5 }
 0x8a9   : > { %v3025_v9 = vpop.f32.mrf.mxu1 }
 0x8aa   : > { %1438 = vst.msk [vmem:[#allocation2 + $0x10] sm:$0xff] %vm1088_vm10, %v1434_v7  ;;  %v1432_v10 = vadd.f32 %v1414_v8, %v3497_v33  ;;  %v1425_v11 = vadd.f32 %v3025_v9, %v1345_v2  ;;  %v3240_v8 = vld [vmem:[%s4041_s28 + $0x8] sm:$0xff]  }
 0x8ab   : > { %v1416_v13 = vpop.f32.mrf.mxu1 }
 0x8ac   : > { %1436 = vst.msk [vmem:[#allocation2] sm:$0xff] %vm1088_vm10, %v1432_v10  ;;  %v1435_v14 = vadd.f32 %v1425_v11, %v3502_v36  ;;  %v1417_v15 = vadd.f32 %v1416_v13, %v1335_v12 }
 0x8ae   : > { %1439 = vst.msk [vmem:[#allocation2 + $0x18] sm:$0xff] %vm1088_vm10, %v1435_v14  ;;  %v1433_v16 = vadd.f32 %v1417_v15, %v3507_v38 }
 0x8b0   : > { %1437 = vst.msk [vmem:[#allocation2 + $0x8] sm:$0xff] %vm1088_vm10, %v1433_v16 }
 0x8b1   : > { %v3589_v31 = vld [vmem:[#allocation2 + $0x10] sm:$0xff] }
 0x8b2   : > { %vm1446_vm5 = vcmp.ge.f32.partialorder %v3589_v31, 0.0  ;;  %v1450_v33 = vmul.f32 0.1, %v3589_v31 }
 0x8b3   : > { %v3593_v17 = vld [vmem:[#allocation2] sm:$0xff] }
 0x8b4   : > { %v1454_v18 = vsel %vm1446_vm5, %v3589_v31, %v1450_v33  ;;  %v1448_v19 = vmul.f32 0.1, %v3593_v17  ;;  %vm1444_vm6 = vcmp.ge.f32.partialorder %v3593_v17, 0.0 }
 0x8b5   : > { %1464 = vrot.lane.b32.xlu0 %v1454_v18, %s4032_s4  ;;  %v3599_v36 = vld [vmem:[#allocation2 + $0x18] sm:$0xff] }
 0x8b6   : > { %vm1447_vm7 = vcmp.ge.f32.partialorder %v3599_v36, 0.0  ;;  %v1451_v38 = vmul.f32 0.1, %v3599_v36  ;;  %v1452_v21 = vsel %vm1444_vm6, %v3593_v17, %v1448_v19 }
 0x8b7   : > { %v3603_v20 = vld [vmem:[#allocation2 + $0x8] sm:$0xff] }
 0x8b8   : > { %v1455_v22 = vsel %vm1447_vm7, %v3599_v36, %v1451_v38  ;;  %v1449_v23 = vmul.f32 0.1, %v3603_v20  ;;  %vm1445_vm8 = vcmp.ge.f32.partialorder %v3603_v20, 0.0  ;;  %vm2088_vm7 = vcmask 392192  }
 0x8b9   : > { %1460 = vrot.lane.b32.xlu0 %v1452_v21, %s4032_s4  ;;  %1466 = vrot.lane.b32.xlu1 %v1455_v22, %s4032_s4 }
 0x8ba   : > { %v1453_v24 = vsel %vm1445_vm8, %v3603_v20, %v1449_v23 }
 0x8bd   : > { %1462 = vrot.lane.b32.xlu1 %v1453_v24, %s4032_s4 }
 0x927   : > { %v1465_v25 = vpop.permute.xlu0 %1464 }
 0x928   : > { %1474 = vst.msk [vmem:[#allocation3 + $0x10] sm:$0xff] %vm776_vm2, %v1465_v25 }
 0x92b   : > { %v1461_v26 = vpop.permute.xlu0 %1460  ;;  %v1467_v27 = vpop.permute.xlu1 %1466 }
 0x92c   : > { %1472 = vst.msk [vmem:[#allocation3] sm:$0xff] %vm776_vm2, %v1461_v26  ;;  %1475 = vst.msk [vmem:[#allocation3 + $0x18] sm:$0xff] %vm776_vm2, %v1467_v27 }
 0x92f   : > { %v1463_v28 = vpop.permute.xlu1 %1462  ;;  %v1478_v29 = vld [vmem:[#allocation3 + $0x10] sm:$0xff] }
 0x930   : > { %1473 = vst.msk [vmem:[#allocation3 + $0x8] sm:$0xff] %vm776_vm2, %v1463_v28 }
 0x933   : > { %v1479_v30 = vld [vmem:[#allocation3 + $0x18] sm:$0xff]  ;;  %v1476_v34 = vld [vmem:[#allocation3] sm:$0xff] }
 0x934   : > { %v3191_v32 = vpack.i.bf16 %v1479_v30, %v1478_v29 }
 0x936   : > { %3192 = vrot.lane.b32.xlu1 %v3191_v32, %s4034_s7  ;;  %3187 = vrot.lane.b32.xlu0 %v3191_v32, %s4040_s29 }
 0x937   : > { %v1477_v35 = vld [vmem:[#allocation3 + $0x8] sm:$0xff] }
 0x938   : > { %v3201_v37 = vpack.i.bf16 %v1477_v35, %v1476_v34  ;;  %v1518_v59 = vpack.c.bf16 %v1477_v35, %v1476_v34 }
 0x93a   : > { %3197 = vrot.lane.b32.xlu0 %v3191_v32, %s4037_s9  ;;  %3202 = vrot.lane.b32.xlu1 %v3201_v37, %s4033_s6 }
 0x93e   : > { %3207 = vrot.lane.b32.xlu0 %v3201_v37, %s4034_s7 }
 0x9a8   : > { %v3188_v39 = vpop.permute.xlu0 %3187  ;;  %v3193_v40 = vpop.permute.xlu1 %3192 }
 0x9a9   : > { %v3190_v41 = vunpack.i.h.bf16 %v3188_v39  ;;  %v3189_v42 = vunpack.i.l.bf16 %v3188_v39  ;;  %v3195_v43 = vunpack.i.h.bf16 %v3193_v40  ;;  %v3194_v44 = vunpack.i.l.bf16 %v3193_v40 }
 0x9ab   : > { %v1523_v45 = vpack.c.bf16 %v3190_v41, %v3189_v42  ;;  %v1522_v46 = vpack.c.bf16 %v3195_v43, %v3194_v44 }
 0x9ac   : > { %v3198_v47 = vpop.permute.xlu0 %3197  ;;  %v3203_v48 = vpop.permute.xlu1 %3202 }
 0x9ad   : > { %v3200_v49 = vunpack.i.h.bf16 %v3198_v47  ;;  %v3199_v50 = vunpack.i.l.bf16 %v3198_v47  ;;  %v3205_v51 = vunpack.i.h.bf16 %v3203_v48  ;;  %v3204_v52 = vunpack.i.l.bf16 %v3203_v48  ;;  %1574 = vrot.lane.b32.xlu1 %v1523_v45, %s4040_s29  ;;  %1572 = vrot.lane.b32.xlu0 %v1522_v46, %s4040_s29  ;;  %v3241_v47 = vld [vmem:[%s3972_s11] sm:$0xff]  }
 0x9ae   : > { %3050 = vmatprep.mubr.msk.bf16.mxu1 %vm1207_vm15, %v3241_v47 }
 0x9af   : > { %v1521_v53 = vpack.c.bf16 %v3200_v49, %v3199_v50  ;;  %v1520_v54 = vpack.c.bf16 %v3205_v51, %v3204_v52 }
 0x9b0   : > { %v3208_v55 = vpop.permute.xlu0 %3207 }
 0x9b1   : > { %v3210_v56 = vunpack.i.h.bf16 %v3208_v55  ;;  %v3209_v57 = vunpack.i.l.bf16 %v3208_v55  ;;  %1570 = vrot.lane.b32.xlu1 %v1521_v53, %s4040_s29  ;;  %1568 = vrot.lane.b32.xlu0 %v1520_v54, %s4040_s29  ;;  %v1699_v55 = vld [vmem:[%s3973_s12 + $0x10] sm:$0xff] }
 0x9b3   : > { %v1519_v58 = vpack.c.bf16 %v3210_v56, %v3209_v57  ;;  %v1700_v56 = vld [vmem:[%s3973_s12 + $0x18] sm:$0xff]  ;;  %v1697_v57 = vld [vmem:[%s3973_s12] sm:$0xff] }
 0x9b5   : > { %1566 = vrot.lane.b32.xlu1 %v1519_v58, %s4040_s29  ;;  %1564 = vrot.lane.b32.xlu0 %v1518_v59, %s4040_s29  ;;  %v1698_v58 = vld [vmem:[%s3973_s12 + $0x8] sm:$0xff] }
 0x9b9   : > { %1540 = vperm.xlu1 %3144, %v1526_v61   ;;  %1545 = vperm.xlu0 %3145, %v1527_v62   ;;  %v3242_v62 = vld [vmem:[%s3972_s11 + $0x8] sm:$0xff]  }
 0x9bd   : > { %1530 = vperm.xlu1 %3144, %v1524_v63   ;;  %1535 = vperm.xlu0 %3145, %v1525_v1  }
 0xa1f   : > { %v1575_v2 = vpop.permute.xlu1 %1574  ;;  %v1573_v3 = vpop.permute.xlu0 %1572 }
 0xa20   : > { %3026 = vmatprep.subr.bf16.mxu0 %v1575_v2 }
 0xa21   : > { %3027 = vmatpush3.bf16.msra.mxu0 %v1575_v2 }
 0xa22   : > { %3028 = vmatprep.subr.bf16.mxu0 %v1573_v3 }
 0xa23   : > { %v1571_v4 = vpop.permute.xlu1 %1570  ;;  %v1569_v5 = vpop.permute.xlu0 %1568 }
 0xa25   : > { %3029 = vmatpush3.bf16.msra.mxu0 %v1573_v3 }
 0xa26   : > { %3030 = vmatprep.subr.bf16.mxu0 %v1571_v4 }
 0xa27   : > { %v1567_v6 = vpop.permute.xlu1 %1566  ;;  %v1565_v7 = vpop.permute.xlu0 %1564 }
 0xa29   : > { %3031 = vmatpush3.bf16.msra.mxu0 %v1571_v4 }
 0xa2a   : > { %3032 = vmatprep.subr.bf16.mxu0 %v1569_v5 }
 0xa2d   : > { %3033 = vmatpush3.bf16.msra.mxu0 %v1569_v5 }
 0xa2e   : > { %3034 = vmatprep.subr.bf16.mxu0 %v1567_v6 }
 0xa31   : > { %3035 = vmatpush3.bf16.msra.mxu0 %v1567_v6 }
 0xa32   : > { %3036 = vmatprep.subr.bf16.mxu0 %v1565_v7 }
 0xa34   : > { %v1541_v9 = vpop.permute.xlu1 %1540  ;;  %v1546_v10 = vpop.permute.xlu0 %1545 }
 0xa35   : > { %3037 = vmatpush3.bf16.msra.mxu0 %v1565_v7 }
 0xa38   : > { %3039 = vmatmul.mubr.msk.bf16.vlgmr.msra.gmra.mxu0 %vm1032_vm9, %v3240_v8  ;;  %v1531_v13 = vpop.permute.xlu1 %1530  ;;  %v1536_v21 = vpop.permute.xlu0 %1535 }
 0xaf8   : > { %v3040_v11 = vpop.f32.mrf.mxu0 }
 0xaf9   : > { %v1631_v12 = vadd.f32 %v3040_v11, %v1541_v9 }
 0xafa   : > { %v1622_v14 = vpop.f32.mrf.mxu0 }
 0xafb   : > { %v1643_v15 = vmul.f32 0.1, %v1631_v12  ;;  %v1623_v16 = vadd.f32 %v1622_v14, %v1531_v13  ;;  %vm1639_vm11 = vcmp.ge.f32.partialorder %v1631_v12, 0.0 }
 0xafc   : > { %v3041_v33 = vpop.f32.mrf.mxu0 }
 0xafd   : > { %v1641_v18 = vmul.f32 0.1, %v1623_v16  ;;  %v1634_v19 = vadd.f32 %v3041_v33, %v1546_v10  ;;  %v1647_v38 = vsel %vm1639_vm11, %v1631_v12, %v1643_v15  ;;  %vm1637_vm12 = vcmp.ge.f32.partialorder %v1623_v16, 0.0 }
 0xafe   : > { %1657 = vrot.lane.b32.xlu1 %v1647_v38, %s4032_s4  ;;  %v1625_v22 = vpop.f32.mrf.mxu0 }
 0xaff   : > { %v1644_v23 = vmul.f32 0.1, %v1634_v19  ;;  %v1626_v24 = vadd.f32 %v1625_v22, %v1536_v21  ;;  %vm1640_vm9 = vcmp.ge.f32.partialorder %v1634_v19, 0.0  ;;  %v1645_v26 = vsel %vm1637_vm12, %v1623_v16, %v1641_v18 }
 0xb01   : > { %v1642_v25 = vmul.f32 0.1, %v1626_v24  ;;  %v1648_v27 = vsel %vm1640_vm9, %v1634_v19, %v1644_v23  ;;  %vm1638_vm13 = vcmp.ge.f32.partialorder %v1626_v24, 0.0 }
 0xb02   : > { %1653 = vrot.lane.b32.xlu1 %v1645_v26, %s4032_s4  ;;  %1659 = vrot.lane.b32.xlu0 %v1648_v27, %s4032_s4 }
 0xb03   : > { %v1646_v28 = vsel %vm1638_vm13, %v1626_v24, %v1642_v25 }
 0xb06   : > { %1655 = vrot.lane.b32.xlu0 %v1646_v28, %s4032_s4 }
 0xb70   : > { %v1658_v29 = vpop.permute.xlu1 %1657 }
 0xb71   : > { %1667 = vst.msk [vmem:[#allocation3 + $0x10] sm:$0xff] %vm776_vm2, %v1658_v29 }
 0xb74   : > { %v1654_v30 = vpop.permute.xlu1 %1653  ;;  %v1660_v32 = vpop.permute.xlu0 %1659 }
 0xb75   : > { %1665 = vst.msk [vmem:[#allocation3] sm:$0xff] %vm776_vm2, %v1654_v30  ;;  %1668 = vst.msk [vmem:[#allocation3 + $0x18] sm:$0xff] %vm776_vm2, %v1660_v32 }
 0xb78   : > { %v1656_v34 = vpop.permute.xlu0 %1655  ;;  %v1671_v35 = vld [vmem:[#allocation3 + $0x10] sm:$0xff] }
 0xb79   : > { %1666 = vst.msk [vmem:[#allocation3 + $0x8] sm:$0xff] %vm776_vm2, %v1656_v34 }
 0xb7c   : > { %v1672_v37 = vld [vmem:[#allocation3 + $0x18] sm:$0xff]  ;;  %v1669_v40 = vld [vmem:[#allocation3] sm:$0xff] }
 0xb7d   : > { %v3211_v39 = vpack.i.bf16 %v1672_v37, %v1671_v35  ;;  %v1696_v42 = vpack.c.bf16 %v1672_v37, %v1671_v35 }
 0xb7f   : > { %3212 = vrot.lane.b32.xlu1 %v3211_v39, %s4037_s9 }
 0xb80   : > { %v1670_v41 = vld [vmem:[#allocation3 + $0x8] sm:$0xff] }
 0xb81   : > { %v3216_v43 = vpack.i.bf16 %v1670_v41, %v1669_v40  ;;  %v1693_v54 = vpack.c.bf16 %v1670_v41, %v1669_v40 }
 0xb83   : > { %1741 = vrot.lane.b32.xlu1 %v1696_v42, %s4033_s6  ;;  %3217 = vrot.lane.b32.xlu0 %v3216_v43, %s4034_s7  ;;  %v3243_v42 = vld [vmem:[%s3974_s13] sm:$0xff]  }
 0xb84   : > { %3062 = vmatprep.mubr.msk.bf16.mxu0 %vm1207_vm15, %v3243_v42 }
 0xbf1   : > { %v3213_v44 = vpop.permute.xlu1 %3212 }
 0xbf2   : > { %v3215_v45 = vunpack.i.h.bf16 %v3213_v44  ;;  %v3214_v46 = vunpack.i.l.bf16 %v3213_v44 }
 0xbf4   : > { %v1695_v48 = vpack.c.bf16 %v3215_v45, %v3214_v46 }
 0xbf5   : > { %v1742_v49 = vpop.permute.xlu1 %1741  ;;  %v3218_v50 = vpop.permute.xlu0 %3217 }
 0xbf6   : > { %v3220_v51 = vunpack.i.h.bf16 %v3218_v50  ;;  %v3219_v52 = vunpack.i.l.bf16 %v3218_v50  ;;  %3042 = vmatprep.subr.bf16.mxu1 %v1742_v49  ;;  %1739 = vrot.lane.b32.xlu0 %v1695_v48, %s4033_s6  ;;  %v1881_v50 = vld [vmem:[%s3975_s14 + $0x18] sm:$0xff] }
 0xbf7   : > { %3043 = vmatpush3.bf16.msra.mxu1 %v1742_v49 }
 0xbf8   : > { %v1694_v53 = vpack.c.bf16 %v3220_v51, %v3219_v52  ;;  %v1878_v51 = vld [vmem:[%s3975_s14] sm:$0xff]  ;;  %v1879_v52 = vld [vmem:[%s3975_s14 + $0x8] sm:$0xff] }
 0xbfa   : > { %1737 = vrot.lane.b32.xlu1 %v1694_v53, %s4033_s6  ;;  %1735 = vrot.lane.b32.xlu0 %v1693_v54, %s4033_s6  ;;  %v1880_v53 = vld [vmem:[%s3975_s14 + $0x10] sm:$0xff] }
 0xbfe   : > { %1713 = vperm.xlu1 %3144, %v1699_v55   ;;  %1718 = vperm.xlu0 %3145, %v1700_v56  }
 0xc02   : > { %1703 = vperm.xlu1 %3144, %v1697_v57   ;;  %1708 = vperm.xlu0 %3145, %v1698_v58   ;;  %v3244_v57 = vld [vmem:[%s3974_s13 + $0x8] sm:$0xff]  }
 0xc68   : > { %v1740_v59 = vpop.permute.xlu0 %1739 }
 0xc69   : > { %3044 = vmatprep.subr.bf16.mxu1 %v1740_v59 }
 0xc6a   : > { %3045 = vmatpush3.bf16.msra.mxu1 %v1740_v59 }
 0xc6c   : > { %v1738_v60 = vpop.permute.xlu1 %1737  ;;  %v1736_v61 = vpop.permute.xlu0 %1735 }
 0xc6d   : > { %3046 = vmatprep.subr.bf16.mxu1 %v1738_v60 }
 0xc6e   : > { %3047 = vmatpush3.bf16.msra.mxu1 %v1738_v60 }
 0xc6f   : > { %3048 = vmatprep.subr.bf16.mxu1 %v1736_v61 }
 0xc72   : > { %3049 = vmatpush3.bf16.msra.mxu1 %v1736_v61 }
 0xc75   : > { %3051 = vmatmul.mubr.msk.bf16.vlgmr.msra.gmra.mxu1 %vm1207_vm15, %v3242_v62 }
 0xc79   : > { %v1714_v63 = vpop.permute.xlu1 %1713  ;;  %v1719_v1 = vpop.permute.xlu0 %1718 }
 0xc7d   : > { %v1704_v4 = vpop.permute.xlu1 %1703  ;;  %v1709_v11 = vpop.permute.xlu0 %1708 }
 0xd35   : > { %v3052_v2 = vpop.f32.mrf.mxu1 }
 0xd36   : > { %v1796_v3 = vadd.f32 %v3052_v2, %v1714_v63 }
 0xd37   : > { %v1787_v5 = vpop.f32.mrf.mxu1 }
 0xd38   : > { %v1808_v6 = vadd.f32 %v1796_v3, %v3589_v31  ;;  %v1788_v7 = vadd.f32 %v1787_v5, %v1704_v4 }
 0xd39   : > { %v3053_v8 = vpop.f32.mrf.mxu1 }
 0xd3a   : > { %1812 = vst.msk [vmem:[#allocation2 + $0x10] sm:$0xff] %vm1088_vm10, %v1808_v6  ;;  %v1806_v9 = vadd.f32 %v1788_v7, %v3593_v17  ;;  %v1799_v10 = vadd.f32 %v3053_v8, %v1719_v1 }
 0xd3b   : > { %v1790_v12 = vpop.f32.mrf.mxu1 }
 0xd3c   : > { %1810 = vst.msk [vmem:[#allocation2] sm:$0xff] %vm1088_vm10, %v1806_v9  ;;  %v1809_v13 = vadd.f32 %v1799_v10, %v3599_v36  ;;  %v1791_v14 = vadd.f32 %v1790_v12, %v1709_v11 }
 0xd3e   : > { %1813 = vst.msk [vmem:[#allocation2 + $0x18] sm:$0xff] %vm1088_vm10, %v1809_v13  ;;  %v1807_v15 = vadd.f32 %v1791_v14, %v3603_v20 }
 0xd40   : > { %1811 = vst.msk [vmem:[#allocation2 + $0x8] sm:$0xff] %vm1088_vm10, %v1807_v15 }
 0xd41   : > { %v1816_v31 = vld [vmem:[#allocation2 + $0x10] sm:$0xff] }
 0xd42   : > { %vm1820_vm14 = vcmp.ge.f32.partialorder %v1816_v31, 0.0  ;;  %v1824_v16 = vmul.f32 0.1, %v1816_v31 }
 0xd43   : > { %v1814_v33 = vld [vmem:[#allocation2] sm:$0xff] }
 0xd44   : > { %v1828_v18 = vsel %vm1820_vm14, %v1816_v31, %v1824_v16  ;;  %v1822_v17 = vmul.f32 0.1, %v1814_v33  ;;  %vm1818_vm0 = vcmp.ge.f32.partialorder %v1814_v33, 0.0 }
 0xd45   : > { %1838 = vrot.lane.b32.xlu1 %v1828_v18, %s4032_s4  ;;  %v1817_v19 = vld [vmem:[#allocation2 + $0x18] sm:$0xff] }
 0xd46   : > { %vm1821_vm1 = vcmp.ge.f32.partialorder %v1817_v19, 0.0  ;;  %v1825_v38 = vmul.f32 0.1, %v1817_v19  ;;  %v1826_v21 = vsel %vm1818_vm0, %v1814_v33, %v1822_v17 }
 0xd47   : > { %v1815_v36 = vld [vmem:[#allocation2 + $0x8] sm:$0xff] }
 0xd48   : > { %v1829_v22 = vsel %vm1821_vm1, %v1817_v19, %v1825_v38  ;;  %v1823_v23 = vmul.f32 0.1, %v1815_v36  ;;  %vm1819_vm3 = vcmp.ge.f32.partialorder %v1815_v36, 0.0 }
 0xd49   : > { %1834 = vrot.lane.b32.xlu1 %v1826_v21, %s4032_s4  ;;  %1840 = vrot.lane.b32.xlu0 %v1829_v22, %s4032_s4 }
 0xd4a   : > { %v1827_v20 = vsel %vm1819_vm3, %v1815_v36, %v1823_v23  ;;  %vm2433_vm3 = vcmask 654336  }
 0xd4d   : > { %1836 = vrot.lane.b32.xlu0 %v1827_v20, %s4032_s4 }
 0xdb7   : > { %v1839_v24 = vpop.permute.xlu1 %1838 }
 0xdb8   : > { %1848 = vst.msk [vmem:[#allocation3 + $0x10] sm:$0xff] %vm776_vm2, %v1839_v24  ;;  %v2045_v24 = vld [vmem:[%s3977_s16 + $0x18] sm:$0xff] }
 0xdbb   : > { %v1835_v25 = vpop.permute.xlu1 %1834  ;;  %v1841_v26 = vpop.permute.xlu0 %1840 }
 0xdbc   : > { %1846 = vst.msk [vmem:[#allocation3] sm:$0xff] %vm776_vm2, %v1835_v25  ;;  %1849 = vst.msk [vmem:[#allocation3 + $0x18] sm:$0xff] %vm776_vm2, %v1841_v26  ;;  %v2043_v25 = vld [vmem:[%s3977_s16 + $0x8] sm:$0xff]  ;;  %v3245_v26 = vld [vmem:[%s3976_s15] sm:$0xff]  }
 0xdbd   : > { %3072 = vmatprep.mubr.msk.bf16.mxu1 %vm2088_vm7, %v3245_v26 }
 0xdbf   : > { %v1837_v27 = vpop.permute.xlu0 %1836  ;;  %v1852_v28 = vld [vmem:[#allocation3 + $0x10] sm:$0xff] }
 0xdc0   : > { %1847 = vst.msk [vmem:[#allocation3 + $0x8] sm:$0xff] %vm776_vm2, %v1837_v27 }
 0xdc3   : > { %v1853_v29 = vld [vmem:[#allocation3 + $0x18] sm:$0xff]  ;;  %v1850_v32 = vld [vmem:[#allocation3] sm:$0xff] }
 0xdc4   : > { %v3221_v30 = vpack.i.bf16 %v1853_v29, %v1852_v28  ;;  %v1877_v35 = vpack.c.bf16 %v1853_v29, %v1852_v28 }
 0xdc6   : > { %3222 = vrot.lane.b32.xlu1 %v3221_v30, %s4037_s9 }
 0xdc7   : > { %v1851_v34 = vld [vmem:[#allocation3 + $0x8] sm:$0xff] }
 0xdc8   : > { %v3226_v37 = vpack.i.bf16 %v1851_v34, %v1850_v32  ;;  %v1874_v49 = vpack.c.bf16 %v1851_v34, %v1850_v32  ;;  %v2042_v32 = vld [vmem:[%s3977_s16] sm:$0xff]  ;;  %v2044_v34 = vld [vmem:[%s3977_s16 + $0x10] sm:$0xff] }
 0xdca   : > { %1922 = vrot.lane.b32.xlu1 %v1877_v35, %s4033_s6  ;;  %3227 = vrot.lane.b32.xlu0 %v3226_v37, %s4034_s7 }
 0xe38   : > { %v3223_v39 = vpop.permute.xlu1 %3222 }
 0xe39   : > { %v3225_v40 = vunpack.i.h.bf16 %v3223_v39  ;;  %v3224_v41 = vunpack.i.l.bf16 %v3223_v39 }
 0xe3b   : > { %v1876_v43 = vpack.c.bf16 %v3225_v40, %v3224_v41  ;;  %v3246_v40 = vld [vmem:[%s3976_s15 + $0x8] sm:$0xff]  }
 0xe3c   : > { %v1923_v44 = vpop.permute.xlu1 %1922  ;;  %v3228_v45 = vpop.permute.xlu0 %3227 }
 0xe3d   : > { %v3230_v46 = vunpack.i.h.bf16 %v3228_v45  ;;  %v3229_v47 = vunpack.i.l.bf16 %v3228_v45  ;;  %3054 = vmatprep.subr.bf16.mxu0 %v1923_v44  ;;  %1920 = vrot.lane.b32.xlu0 %v1876_v43, %s4033_s6 }
 0xe3e   : > { %3055 = vmatpush3.bf16.msra.mxu0 %v1923_v44 }
 0xe3f   : > { %v1875_v48 = vpack.c.bf16 %v3230_v46, %v3229_v47 }
 0xe41   : > { %1918 = vrot.lane.b32.xlu1 %v1875_v48, %s4033_s6  ;;  %1916 = vrot.lane.b32.xlu0 %v1874_v49, %s4033_s6 }
 0xe45   : > { %1899 = vperm.xlu1 %3144, %v1881_v50   ;;  %1884 = vperm.xlu0 %3145, %v1878_v51  }
 0xe49   : > { %1889 = vperm.xlu1 %3144, %v1879_v52   ;;  %1894 = vperm.xlu0 %3145, %v1880_v53  }
 0xeaf   : > { %v1921_v54 = vpop.permute.xlu0 %1920 }
 0xeb0   : > { %3056 = vmatprep.subr.bf16.mxu0 %v1921_v54 }
 0xeb1   : > { %3057 = vmatpush3.bf16.msra.mxu0 %v1921_v54 }
 0xeb3   : > { %v1919_v55 = vpop.permute.xlu1 %1918  ;;  %v1917_v56 = vpop.permute.xlu0 %1916 }
 0xeb4   : > { %3058 = vmatprep.subr.bf16.mxu0 %v1919_v55 }
 0xeb5   : > { %3059 = vmatpush3.bf16.msra.mxu0 %v1919_v55 }
 0xeb6   : > { %3060 = vmatprep.subr.bf16.mxu0 %v1917_v56 }
 0xeb9   : > { %3061 = vmatpush3.bf16.msra.mxu0 %v1917_v56 }
 0xebc   : > { %3063 = vmatmul.mubr.msk.bf16.vlgmr.msra.gmra.mxu0 %vm1207_vm15, %v3244_v57 }
 0xec0   : > { %v1885_v58 = vpop.permute.xlu0 %1884  ;;  %v1900_v59 = vpop.permute.xlu1 %1899 }
 0xec4   : > { %v1895_v60 = vpop.permute.xlu0 %1894  ;;  %v1890_v4 = vpop.permute.xlu1 %1889 }
 0xf7c   : > { %v3064_v61 = vpop.f32.mrf.mxu0 }
 0xf7d   : > { %v1977_v62 = vadd.f32 %v3064_v61, %v1895_v60 }
 0xf7e   : > { %v1968_v63 = vpop.f32.mrf.mxu0 }
 0xf7f   : > { %1985 = vst.msk [vmem:[#allocation2 + $0x10] sm:$0xff] %vm1088_vm10, %v1977_v62  ;;  %v1969_v1 = vadd.f32 %v1968_v63, %v1885_v58 }
 0xf80   : > { %v3065_v2 = vpop.f32.mrf.mxu0 }
 0xf81   : > { %1983 = vst.msk [vmem:[#allocation2] sm:$0xff] %vm1088_vm10, %v1969_v1  ;;  %v1980_v3 = vadd.f32 %v3065_v2, %v1900_v59 }
 0xf82   : > { %v1971_v5 = vpop.f32.mrf.mxu0 }
 0xf83   : > { %1986 = vst.msk [vmem:[#allocation2 + $0x18] sm:$0xff] %vm1088_vm10, %v1980_v3  ;;  %v1972_v6 = vadd.f32 %v1971_v5, %v1890_v4 }
 0xf85   : > { %1984 = vst.msk [vmem:[#allocation2 + $0x8] sm:$0xff] %vm1088_vm10, %v1972_v6 }
 0xf86   : > { %v3730_v8 = vld [vmem:[#allocation2 + $0x10] sm:$0xff] }
 0xf87   : > { %v1997_v13 = vmul.f32 0.1, %v3730_v8  ;;  %vm1993_vm5 = vcmp.ge.f32.partialorder %v3730_v8, 0.0 }
 0xf88   : > { %v3728_v7 = vld [vmem:[#allocation2] sm:$0xff] }
 0xf89   : > { %vm1991_vm15 = vcmp.ge.f32.partialorder %v3728_v7, 0.0  ;;  %v1995_v9 = vmul.f32 0.1, %v3728_v7  ;;  %v2001_v16 = vsel %vm1993_vm5, %v3730_v8, %v1997_v13 }
 0xf8a   : > { %v3734_v10 = vld [vmem:[#allocation2 + $0x18] sm:$0xff] }
 0xf8b   : > { %v1999_v11 = vsel %vm1991_vm15, %v3728_v7, %v1995_v9  ;;  %vm1994_vm4 = vcmp.ge.f32.partialorder %v3734_v10, 0.0  ;;  %v1998_v12 = vmul.f32 0.1, %v3734_v10  ;;  %v2198_v9 = vld [vmem:[%s3979_s18 + $0x18] sm:$0xff] }
 0xf8c   : > { %2007 = vrot.lane.b32.xlu0 %v1999_v11, %s4032_s4  ;;  %v3742_v14 = vld [vmem:[#allocation2 + $0x8] sm:$0xff] }
 0xf8d   : > { %v2002_v15 = vsel %vm1994_vm4, %v3734_v10, %v1998_v12  ;;  %v1996_v31 = vmul.f32 0.1, %v3742_v14  ;;  %vm1992_vm6 = vcmp.ge.f32.partialorder %v3742_v14, 0.0  ;;  %v2196_v11 = vld [vmem:[%s3979_s18 + $0x8] sm:$0xff]  ;;  %v3247_v12 = vld [vmem:[%s3978_s17] sm:$0xff]  }
 0xf8e   : > { %2013 = vrot.lane.b32.xlu1 %v2002_v15, %s4032_s4 }
 0xf8f   : > { %v2000_v33 = vsel %vm1992_vm6, %v3742_v14, %v1996_v31 }
 0xf90   : > { %2011 = vrot.lane.b32.xlu0 %v2001_v16, %s4032_s4 }
 0xf92   : > { %2009 = vrot.lane.b32.xlu1 %v2000_v33, %s4032_s4  ;;  %v2197_v33 = vld [vmem:[%s3979_s18 + $0x10] sm:$0xff] }
 0xffe   : > { %v2008_v18 = vpop.permute.xlu0 %2007 }
 0xfff   : > { %2019 = vst.msk [vmem:[#allocation3] sm:$0xff] %vm776_vm2, %v2008_v18  ;;  %v2195_v18 = vld [vmem:[%s3979_s18] sm:$0xff] }
0x1000   : > { %v2014_v17 = vpop.permute.xlu1 %2013 }
0x1001   : > { %2022 = vst.msk [vmem:[#allocation3 + $0x18] sm:$0xff] %vm776_vm2, %v2014_v17 }
0x1002   : > { %v2012_v19 = vpop.permute.xlu0 %2011 }
0x1003   : > { %2021 = vst.msk [vmem:[#allocation3 + $0x10] sm:$0xff] %vm776_vm2, %v2012_v19 }
0x1004   : > { %v2010_v38 = vpop.permute.xlu1 %2009 }
0x1005   : > { %2020 = vst.msk [vmem:[#allocation3 + $0x8] sm:$0xff] %vm776_vm2, %v2010_v38 }
0x1006   : > { %v2023_v36 = vld [vmem:[#allocation3] sm:$0xff] }
0x1007   : > { %2028 = vrot.lane.b32.xlu0 %v2023_v36, %s4034_s7 }
0x1008   : > { %v2026_v21 = vld [vmem:[#allocation3 + $0x18] sm:$0xff] }
0x1009   : > { %2032 = vrot.lane.b32.xlu1 %v2026_v21, %s4037_s9 }
0x100a   : > { %v2025_v23 = vld [vmem:[#allocation3 + $0x10] sm:$0xff] }
0x100c   : > { %v2024_v22 = vld [vmem:[#allocation3 + $0x8] sm:$0xff] }
0x100d   : > { %v2040_v20 = vpack.c.bf16 %v2025_v23, %v2024_v22 }
0x100f   : > { %2081 = vrot.lane.b32.xlu0 %v2040_v20, %s4033_s6 }
0x1013   : > { %2063 = vperm.xlu0 %3145, %v2045_v24  }
0x1017   : > { %2053 = vperm.xlu0 %3145, %v2043_v25  }
0x1079   : > { %v2029_v29 = vpop.permute.xlu0 %2028 }
0x107a   : > { %v2039_v30 = vpack.c.bf16 %v2029_v29, %v2023_v36  ;;  %v3248_v36 = vld [vmem:[%s3978_s17 + $0x8] sm:$0xff]  }
0x107b   : > { %v2033_v27 = vpop.permute.xlu1 %2032 }
0x107c   : > { %v2041_v28 = vpack.c.bf16 %v2026_v21, %v2033_v27 }
0x107e   : > { %2083 = vrot.lane.b32.xlu1 %v2041_v28, %s4033_s6 }
0x1081   : > { %v2082_v37 = vpop.permute.xlu0 %2081 }
0x1082   : > { %2079 = vrot.lane.b32.xlu1 %v2039_v30, %s4033_s6 }
0x1086   : > { %2048 = vperm.xlu1 %3144, %v2042_v32  }
0x108a   : > { %2058 = vperm.xlu1 %3144, %v2044_v34  }
0x108e   : > { %v2064_v42 = vpop.permute.xlu0 %2063 }
0x1092   : > { %v2054_v51 = vpop.permute.xlu0 %2053 }
0x10f0   : > { %v2084_v35 = vpop.permute.xlu1 %2083 }
0x10f1   : > { %3066 = vmatprep.subr.bf16.mxu1 %v2084_v35 }
0x10f2   : > { %3067 = vmatpush3.bf16.msra.mxu1 %v2084_v35 }
0x10f3   : > { %3068 = vmatprep.subr.bf16.mxu1 %v2082_v37 }
0x10f4   : > { %v2080_v39 = vpop.permute.xlu1 %2079 }
0x10f6   : > { %3069 = vmatpush3.bf16.msra.mxu1 %v2082_v37 }
0x10f7   : > { %3070 = vmatprep.subr.bf16.mxu1 %v2080_v39 }
0x10fa   : > { %3071 = vmatpush3.bf16.msra.mxu1 %v2080_v39 }
0x10fd   : > { %3073 = vmatmul.mubr.msk.bf16.vlgmr.msra.gmra.mxu1 %vm2088_vm7, %v3246_v40 }
0x10fe   : > { %3082 = vmatprep.mubr.msk.bf16.mxu1 %vm2088_vm7, %v3247_v12 }
0x1101   : > { %v2049_v41 = vpop.permute.xlu1 %2048 }
0x1105   : > { %v2059_v44 = vpop.permute.xlu1 %2058 }
0x11bd   : > { %v3074_v43 = vpop.f32.mrf.mxu1 }
0x11be   : > { %v2138_v45 = vadd.f32 %v3074_v43, %v2059_v44 }
0x11bf   : > { %v2129_v46 = vpop.f32.mrf.mxu1 }
0x11c0   : > { %v2130_v47 = vadd.f32 %v2129_v46, %v2049_v41  ;;  %v2150_v52 = vmul.f32 0.1, %v2138_v45  ;;  %vm2146_vm12 = vcmp.ge.f32.partialorder %v2138_v45, 0.0 }
0x11c1   : > { %v3075_v48 = vpop.f32.mrf.mxu1 }
0x11c2   : > { %vm2144_vm8 = vcmp.ge.f32.partialorder %v2130_v47, 0.0  ;;  %v2148_v49 = vmul.f32 0.1, %v2130_v47  ;;  %v2141_v50 = vadd.f32 %v3075_v48, %v2064_v42  ;;  %v2154_v59 = vsel %vm2146_vm12, %v2138_v45, %v2150_v52 }
0x11c3   : > { %v2132_v53 = vpop.f32.mrf.mxu1  ;;  %vm2791_vm12 = vcmask 125952  }
0x11c4   : > { %vm2147_vm11 = vcmp.ge.f32.partialorder %v2141_v50, 0.0  ;;  %v2151_v54 = vmul.f32 0.1, %v2141_v50  ;;  %v2133_v55 = vadd.f32 %v2132_v53, %v2054_v51  ;;  %v2152_v56 = vsel %vm2144_vm8, %v2130_v47, %v2148_v49 }
0x11c5   : > { %2160 = vrot.lane.b32.xlu1 %v2152_v56, %s4032_s4 }
0x11c6   : > { %v2149_v57 = vmul.f32 0.1, %v2133_v55  ;;  %v2155_v58 = vsel %vm2147_vm11, %v2141_v50, %v2151_v54  ;;  %vm2145_vm9 = vcmp.ge.f32.partialorder %v2133_v55, 0.0 }
0x11c7   : > { %2166 = vrot.lane.b32.xlu0 %v2155_v58, %s4032_s4 }
0x11c8   : > { %v2153_v60 = vsel %vm2145_vm9, %v2133_v55, %v2149_v57 }
0x11c9   : > { %2164 = vrot.lane.b32.xlu1 %v2154_v59, %s4032_s4 }
0x11cb   : > { %2162 = vrot.lane.b32.xlu0 %v2153_v60, %s4032_s4 }
0x1237   : > { %v2161_v61 = vpop.permute.xlu1 %2160 }
0x1238   : > { %2172 = vst.msk [vmem:[#allocation3] sm:$0xff] %vm776_vm2, %v2161_v61 }
0x1239   : > { %v2167_v62 = vpop.permute.xlu0 %2166 }
0x123a   : > { %2175 = vst.msk [vmem:[#allocation3 + $0x18] sm:$0xff] %vm776_vm2, %v2167_v62 }
0x123b   : > { %v2165_v63 = vpop.permute.xlu1 %2164 }
0x123c   : > { %2174 = vst.msk [vmem:[#allocation3 + $0x10] sm:$0xff] %vm776_vm2, %v2165_v63 }
0x123d   : > { %v2163_v1 = vpop.permute.xlu0 %2162 }
0x123e   : > { %2173 = vst.msk [vmem:[#allocation3 + $0x8] sm:$0xff] %vm776_vm2, %v2163_v1  ;;  %v3249_v1 = vld [vmem:[%s3980_s19] sm:$0xff]  }
0x123f   : > { %v2176_v2 = vld [vmem:[#allocation3] sm:$0xff]  ;;  %3096 = vmatprep.mubr.msk.bf16.mxu0 %vm2433_vm3, %v3249_v1 }
0x1240   : > { %2181 = vrot.lane.b32.xlu1 %v2176_v2, %s4034_s7 }
0x1241   : > { %v2179_v3 = vld [vmem:[#allocation3 + $0x18] sm:$0xff] }
0x1242   : > { %2185 = vrot.lane.b32.xlu0 %v2179_v3, %s4037_s9 }
0x1243   : > { %v2178_v5 = vld [vmem:[#allocation3 + $0x10] sm:$0xff] }
0x1245   : > { %v2177_v4 = vld [vmem:[#allocation3 + $0x8] sm:$0xff] }
0x1246   : > { %v2193_v6 = vpack.c.bf16 %v2178_v5, %v2177_v4  ;;  %v2382_v5 = vld [vmem:[%s3981_s20 + $0x18] sm:$0xff] }
0x1248   : > { %2234 = vrot.lane.b32.xlu1 %v2193_v6, %s4033_s6  ;;  %v2379_v6 = vld [vmem:[%s3981_s20] sm:$0xff] }
0x124c   : > { %2216 = vperm.xlu1 %3144, %v2198_v9   ;;  %v2380_v9 = vld [vmem:[%s3981_s20 + $0x8] sm:$0xff] }
0x1250   : > { %2206 = vperm.xlu1 %3144, %v2196_v11   ;;  %v2381_v11 = vld [vmem:[%s3981_s20 + $0x10] sm:$0xff] }
0x12b2   : > { %v2182_v31 = vpop.permute.xlu1 %2181 }
0x12b3   : > { %v2192_v16 = vpack.c.bf16 %v2182_v31, %v2176_v2 }
0x12b4   : > { %v2186_v13 = vpop.permute.xlu0 %2185 }
0x12b5   : > { %v2194_v15 = vpack.c.bf16 %v2179_v3, %v2186_v13 }
0x12b7   : > { %2236 = vrot.lane.b32.xlu0 %v2194_v15, %s4033_s6 }
0x12ba   : > { %v2235_v19 = vpop.permute.xlu1 %2234 }
0x12bb   : > { %2232 = vrot.lane.b32.xlu0 %v2192_v16, %s4033_s6 }
0x12bf   : > { %2211 = vperm.xlu0 %3145, %v2197_v33   ;;  %v3250_v33 = vld [vmem:[%s3980_s19 + $0x8] sm:$0xff]  }
0x12c3   : > { %2201 = vperm.xlu0 %3145, %v2195_v18  }
0x12c7   : > { %v2217_v22 = vpop.permute.xlu1 %2216 }
0x12cb   : > { %v2207_v32 = vpop.permute.xlu1 %2206 }
0x1329   : > { %v2237_v17 = vpop.permute.xlu0 %2236 }
0x132a   : > { %3076 = vmatprep.subr.bf16.mxu1 %v2237_v17 }
0x132b   : > { %3077 = vmatpush3.bf16.msra.mxu1 %v2237_v17 }
0x132c   : > { %3078 = vmatprep.subr.bf16.mxu1 %v2235_v19 }
0x132d   : > { %v2233_v38 = vpop.permute.xlu0 %2232 }
0x132f   : > { %3079 = vmatpush3.bf16.msra.mxu1 %v2235_v19 }
0x1330   : > { %3080 = vmatprep.subr.bf16.mxu1 %v2233_v38 }
0x1333   : > { %3081 = vmatpush3.bf16.msra.mxu1 %v2233_v38 }
0x1336   : > { %3083 = vmatmul.mubr.msk.bf16.vlgmr.msra.gmra.mxu1 %vm2088_vm7, %v3248_v36 }
0x133a   : > { %v2212_v21 = vpop.permute.xlu0 %2211 }
0x133e   : > { %v2202_v24 = vpop.permute.xlu0 %2201 }
0x13f6   : > { %v3084_v23 = vpop.f32.mrf.mxu1 }
0x13f7   : > { %v2290_v20 = vadd.f32 %v3084_v23, %v2212_v21 }
0x13f8   : > { %v2281_v25 = vpop.f32.mrf.mxu1 }
0x13f9   : > { %v2302_v26 = vadd.f32 %v2290_v20, %v3730_v8  ;;  %v2282_v27 = vadd.f32 %v2281_v25, %v2202_v24 }
0x13fa   : > { %v3085_v28 = vpop.f32.mrf.mxu1 }
0x13fb   : > { %2306 = vst.msk [vmem:[#allocation2 + $0x10] sm:$0xff] %vm1088_vm10, %v2302_v26  ;;  %v2300_v29 = vadd.f32 %v2282_v27, %v3728_v7  ;;  %v2293_v30 = vadd.f32 %v3085_v28, %v2217_v22 }
0x13fc   : > { %v2284_v34 = vpop.f32.mrf.mxu1 }
0x13fd   : > { %2304 = vst.msk [vmem:[#allocation2] sm:$0xff] %vm1088_vm10, %v2300_v29  ;;  %v2303_v35 = vadd.f32 %v2293_v30, %v3734_v10  ;;  %v2285_v37 = vadd.f32 %v2284_v34, %v2207_v32 }
0x13ff   : > { %2307 = vst.msk [vmem:[#allocation2 + $0x18] sm:$0xff] %vm1088_vm10, %v2303_v35  ;;  %v2301_v39 = vadd.f32 %v2285_v37, %v3742_v14 }
0x1401   : > { %2305 = vst.msk [vmem:[#allocation2 + $0x8] sm:$0xff] %vm1088_vm10, %v2301_v39 }
0x1402   : > { %v3822_v8 = vld [vmem:[#allocation2 + $0x10] sm:$0xff] }
0x1403   : > { %vm2314_vm13 = vcmp.ge.f32.partialorder %v3822_v8, 0.0  ;;  %v2318_v7 = vmul.f32 0.1, %v3822_v8 }
0x1404   : > { %v3826_v40 = vld [vmem:[#allocation2] sm:$0xff] }
0x1405   : > { %v2322_v41 = vsel %vm2314_vm13, %v3822_v8, %v2318_v7  ;;  %v2316_v42 = vmul.f32 0.1, %v3826_v40  ;;  %vm2312_vm14 = vcmp.ge.f32.partialorder %v3826_v40, 0.0 }
0x1406   : > { %2332 = vrot.lane.b32.xlu0 %v2322_v41, %s4032_s4  ;;  %v3831_v10 = vld [vmem:[#allocation2 + $0x18] sm:$0xff] }
0x1407   : > { %vm2315_vm0 = vcmp.ge.f32.partialorder %v3831_v10, 0.0  ;;  %v2319_v14 = vmul.f32 0.1, %v3831_v10  ;;  %v2320_v45 = vsel %vm2312_vm14, %v3826_v40, %v2316_v42 }
0x1408   : > { %v3836_v43 = vld [vmem:[#allocation2 + $0x8] sm:$0xff] }
0x1409   : > { %v2323_v44 = vsel %vm2315_vm0, %v3831_v10, %v2319_v14  ;;  %v2317_v46 = vmul.f32 0.1, %v3836_v43  ;;  %vm2313_vm1 = vcmp.ge.f32.partialorder %v3836_v43, 0.0 }
0x140a   : > { %2334 = vrot.lane.b32.xlu1 %v2323_v44, %s4032_s4  ;;  %2328 = vrot.lane.b32.xlu0 %v2320_v45, %s4032_s4 }
0x140b   : > { %v2321_v47 = vsel %vm2313_vm1, %v3836_v43, %v2317_v46 }
0x140e   : > { %2330 = vrot.lane.b32.xlu1 %v2321_v47, %s4032_s4 }
0x1478   : > { %v2333_v48 = vpop.permute.xlu0 %2332 }
0x1479   : > { %2342 = vst.msk [vmem:[#allocation3 + $0x10] sm:$0xff] %vm776_vm2, %v2333_v48  ;;  %v2543_v48 = vld [vmem:[%s3983_s22 + $0x18] sm:$0xff] }
0x147c   : > { %v2335_v49 = vpop.permute.xlu1 %2334  ;;  %v2329_v50 = vpop.permute.xlu0 %2328 }
0x147d   : > { %2343 = vst.msk [vmem:[#allocation3 + $0x18] sm:$0xff] %vm776_vm2, %v2335_v49  ;;  %2340 = vst.msk [vmem:[#allocation3] sm:$0xff] %vm776_vm2, %v2329_v50  ;;  %v2541_v49 = vld [vmem:[%s3983_s22 + $0x8] sm:$0xff]  ;;  %v3251_v50 = vld [vmem:[%s3982_s21] sm:$0xff]  }
0x147e   : > { %3106 = vmatprep.mubr.msk.bf16.mxu1 %vm2088_vm7, %v3251_v50 }
0x1480   : > { %v2331_v51 = vpop.permute.xlu1 %2330  ;;  %v2346_v52 = vld [vmem:[#allocation3 + $0x10] sm:$0xff] }
0x1481   : > { %2341 = vst.msk [vmem:[#allocation3 + $0x8] sm:$0xff] %vm776_vm2, %v2331_v51  ;;  %2363 = vrot.lane.b32.xlu0 %v2346_v52, %s4034_s7 }
0x1484   : > { %v2347_v53 = vld [vmem:[#allocation3 + $0x18] sm:$0xff]  ;;  %v2344_v55 = vld [vmem:[#allocation3] sm:$0xff] }
0x1485   : > { %2367 = vrot.lane.b32.xlu1 %v2347_v53, %s4037_s9  ;;  %2360 = vrot.lane.b32.xlu0 %v2346_v52, %s4037_s9 }
0x1488   : > { %v2345_v54 = vld [vmem:[#allocation3 + $0x8] sm:$0xff] }
0x1489   : > { %2356 = vrot.lane.b32.xlu1 %v2345_v54, %s4034_s7  ;;  %2349 = vrot.lane.b32.xlu0 %v2344_v55, %s4034_s7 }
0x148d   : > { %2353 = vrot.lane.b32.xlu1 %v2345_v54, %s4037_s9 }
0x14f3   : > { %v2364_v56 = vpop.permute.xlu0 %2363 }
0x14f4   : > { %v2377_v57 = vpack.c.bf16 %v2364_v56, %v2346_v52  ;;  %v2540_v56 = vld [vmem:[%s3983_s22] sm:$0xff] }
0x14f6   : > { %2424 = vrot.lane.b32.xlu0 %v2377_v57, %s4033_s6 }
0x14f7   : > { %v2368_v58 = vpop.permute.xlu1 %2367  ;;  %v2361_v59 = vpop.permute.xlu0 %2360 }
0x14f8   : > { %v2378_v60 = vpack.c.bf16 %v2347_v53, %v2368_v58 }
0x14fa   : > { %2426 = vrot.lane.b32.xlu1 %v2378_v60, %s4033_s6  ;;  %v3252_v60 = vld [vmem:[%s3982_s21 + $0x8] sm:$0xff]  }
0x14fb   : > { %v2357_v61 = vpop.permute.xlu1 %2356  ;;  %v2350_v63 = vpop.permute.xlu0 %2349 }
0x14fc   : > { %v2376_v62 = vpack.c.bf16 %v2361_v59, %v2357_v61  ;;  %v2374_v3 = vpack.c.bf16 %v2350_v63, %v2344_v55  ;;  %v2542_v55 = vld [vmem:[%s3983_s22 + $0x10] sm:$0xff] }
0x14fe   : > { %2422 = vrot.lane.b32.xlu1 %v2376_v62, %s4033_s6 }
0x14ff   : > { %v2354_v2 = vpop.permute.xlu1 %2353 }
0x1500   : > { %v2375_v4 = vpack.c.bf16 %v2345_v54, %v2354_v2 }
0x1502   : > { %2420 = vrot.lane.b32.xlu0 %v2375_v4, %s4033_s6  ;;  %2418 = vrot.lane.b32.xlu1 %v2374_v3, %s4033_s6 }
0x1506   : > { %2400 = vperm.xlu0 %3145, %v2382_v5   ;;  %2385 = vperm.xlu1 %3144, %v2379_v6  }
0x150a   : > { %2390 = vperm.xlu0 %3145, %v2380_v9   ;;  %2395 = vperm.xlu1 %3144, %v2381_v11  }
0x1568   : > { %v2425_v13 = vpop.permute.xlu0 %2424 }
0x156c   : > { %v2427_v12 = vpop.permute.xlu1 %2426 }
0x156d   : > { %3086 = vmatprep.subr.bf16.mxu0 %v2427_v12 }
0x156e   : > { %3087 = vmatpush3.bf16.msra.mxu0 %v2427_v12 }
0x156f   : > { %3088 = vmatprep.subr.bf16.mxu0 %v2425_v13 }
0x1570   : > { %v2423_v15 = vpop.permute.xlu1 %2422 }
0x1572   : > { %3089 = vmatpush3.bf16.msra.mxu0 %v2425_v13 }
0x1573   : > { %3090 = vmatprep.subr.bf16.mxu0 %v2423_v15 }
0x1574   : > { %v2421_v31 = vpop.permute.xlu0 %2420  ;;  %v2419_v16 = vpop.permute.xlu1 %2418 }
0x1576   : > { %3091 = vmatpush3.bf16.msra.mxu0 %v2423_v15 }
0x1577   : > { %3092 = vmatprep.subr.bf16.mxu0 %v2421_v31 }
0x157a   : > { %3093 = vmatpush3.bf16.msra.mxu0 %v2421_v31 }
0x157b   : > { %3094 = vmatprep.subr.bf16.mxu0 %v2419_v16 }
0x157e   : > { %3095 = vmatpush3.bf16.msra.mxu0 %v2419_v16 }
0x157f   : > { %3110 = vmatprep.subr.bf16.mxu0 %v3263_v0 }
0x1581   : > { %3097 = vmatmul.mubr.msk.bf16.vlgmr.msra.gmra.mxu0 %vm2433_vm3, %v3250_v33  ;;  %v2386_v18 = vpop.permute.xlu1 %2385  ;;  %v2401_v17 = vpop.permute.xlu0 %2400 }
0x1585   : > { %v2396_v38 = vpop.permute.xlu1 %2395  ;;  %v2391_v25 = vpop.permute.xlu0 %2390 }
0x1641   : > { %v3098_v19 = vpop.f32.mrf.mxu0 }
0x1642   : > { %v2483_v36 = vadd.f32 %v3098_v19, %v2396_v38 }
0x1643   : > { %v2474_v21 = vpop.f32.mrf.mxu0 }
0x1644   : > { %v2475_v22 = vadd.f32 %v2474_v21, %v2386_v18  ;;  %v2495_v26 = vmul.f32 0.1, %v2483_v36  ;;  %vm2491_vm5 = vcmp.ge.f32.partialorder %v2483_v36, 0.0 }
0x1645   : > { %v3099_v23 = vpop.f32.mrf.mxu0 }
0x1646   : > { %vm2489_vm15 = vcmp.ge.f32.partialorder %v2475_v22, 0.0  ;;  %v2493_v20 = vmul.f32 0.1, %v2475_v22  ;;  %v2486_v24 = vadd.f32 %v3099_v23, %v2401_v17  ;;  %v2499_v35 = vsel %vm2491_vm5, %v2483_v36, %v2495_v26 }
0x1647   : > { %v2477_v27 = vpop.f32.mrf.mxu0 }
0x1648   : > { %vm2492_vm4 = vcmp.ge.f32.partialorder %v2486_v24, 0.0  ;;  %v2496_v28 = vmul.f32 0.1, %v2486_v24  ;;  %v2478_v29 = vadd.f32 %v2477_v27, %v2391_v25  ;;  %v2497_v30 = vsel %vm2489_vm15, %v2475_v22, %v2493_v20 }
0x1649   : > { %2505 = vrot.lane.b32.xlu1 %v2497_v30, %s4032_s4 }
0x164a   : > { %v2494_v32 = vmul.f32 0.1, %v2478_v29  ;;  %v2500_v34 = vsel %vm2492_vm4, %v2486_v24, %v2496_v28  ;;  %vm2490_vm6 = vcmp.ge.f32.partialorder %v2478_v29, 0.0 }
0x164b   : > { %2511 = vrot.lane.b32.xlu0 %v2500_v34, %s4032_s4 }
0x164c   : > { %v2498_v37 = vsel %vm2490_vm6, %v2478_v29, %v2494_v32 }
0x164d   : > { %2509 = vrot.lane.b32.xlu1 %v2499_v35, %s4032_s4 }
0x164f   : > { %2507 = vrot.lane.b32.xlu0 %v2498_v37, %s4032_s4 }
0x16bb   : > { %v2506_v39 = vpop.permute.xlu1 %2505 }
0x16bc   : > { %2517 = vst.msk [vmem:[#allocation3] sm:$0xff] %vm776_vm2, %v2506_v39 }
0x16bd   : > { %v2512_v7 = vpop.permute.xlu0 %2511 }
0x16be   : > { %2520 = vst.msk [vmem:[#allocation3 + $0x18] sm:$0xff] %vm776_vm2, %v2512_v7 }
0x16bf   : > { %v2510_v41 = vpop.permute.xlu1 %2509 }
0x16c0   : > { %2519 = vst.msk [vmem:[#allocation3 + $0x10] sm:$0xff] %vm776_vm2, %v2510_v41 }
0x16c1   : > { %v2508_v42 = vpop.permute.xlu0 %2507 }
0x16c2   : > { %2518 = vst.msk [vmem:[#allocation3 + $0x8] sm:$0xff] %vm776_vm2, %v2508_v42 }
0x16c3   : > { %v2521_v14 = vld [vmem:[#allocation3] sm:$0xff] }
0x16c4   : > { %2526 = vrot.lane.b32.xlu1 %v2521_v14, %s4034_s7 }
0x16c5   : > { %v2524_v44 = vld [vmem:[#allocation3 + $0x18] sm:$0xff] }
0x16c6   : > { %2530 = vrot.lane.b32.xlu0 %v2524_v44, %s4037_s9 }
0x16c7   : > { %v2523_v46 = vld [vmem:[#allocation3 + $0x10] sm:$0xff] }
0x16c9   : > { %v2522_v45 = vld [vmem:[#allocation3 + $0x8] sm:$0xff] }
0x16ca   : > { %v2538_v47 = vpack.c.bf16 %v2523_v46, %v2522_v45  ;;  %v2721_v45 = vld [vmem:[%s3985_s24] sm:$0xf] }
0x16cc   : > { %2579 = vrot.lane.b32.xlu1 %v2538_v47, %s4033_s6 }
0x16d0   : > { %2561 = vperm.xlu1 %3144, %v2543_v48  }
0x16d4   : > { %2551 = vperm.xlu1 %3144, %v2541_v49  }
0x1736   : > { %v2527_v53 = vpop.permute.xlu1 %2526 }
0x1737   : > { %v2537_v54 = vpack.c.bf16 %v2527_v53, %v2521_v14 }
0x1738   : > { %v2531_v51 = vpop.permute.xlu0 %2530 }
0x1739   : > { %v2539_v52 = vpack.c.bf16 %v2524_v44, %v2531_v51  ;;  %v2715_v51 = vld [vmem:[%s3984_s23] sm:$0x3] }
0x173b   : > { %2581 = vrot.lane.b32.xlu0 %v2539_v52, %s4033_s6 }
0x173e   : > { %v2580_v58 = vpop.permute.xlu1 %2579 }
0x173f   : > { %2577 = vrot.lane.b32.xlu0 %v2537_v54, %s4033_s6 }
0x1743   : > { %2556 = vperm.xlu0 %3145, %v2542_v55  }
0x1747   : > { %2546 = vperm.xlu0 %3145, %v2540_v56  }
0x174b   : > { %v2562_v62 = vpop.permute.xlu1 %2561 }
0x174f   : > { %v2552_v12 = vpop.permute.xlu1 %2551 }
0x17ad   : > { %v2582_v57 = vpop.permute.xlu0 %2581 }
0x17ae   : > { %3100 = vmatprep.subr.bf16.mxu1 %v2582_v57 }
0x17af   : > { %3101 = vmatpush3.bf16.msra.mxu1 %v2582_v57 }
0x17b0   : > { %3102 = vmatprep.subr.bf16.mxu1 %v2580_v58 }
0x17b1   : > { %v2578_v59 = vpop.permute.xlu0 %2577 }
0x17b3   : > { %3103 = vmatpush3.bf16.msra.mxu1 %v2580_v58 }
0x17b4   : > { %3104 = vmatprep.subr.bf16.mxu1 %v2578_v59 }
0x17b7   : > { %3105 = vmatpush3.bf16.msra.mxu1 %v2578_v59 }
0x17ba   : > { %3107 = vmatmul.mubr.msk.bf16.vlgmr.msra.gmra.mxu1 %vm2088_vm7, %v3252_v60 }
0x17be   : > { %v2557_v61 = vpop.permute.xlu0 %2556 }
0x17c2   : > { %v2547_v2 = vpop.permute.xlu0 %2546 }
0x187a   : > { %v3108_v63 = vpop.f32.mrf.mxu1 }
0x187b   : > { %v2635_v1 = vadd.f32 %v3108_v63, %v2557_v61 }
0x187c   : > { %v2626_v3 = vpop.f32.mrf.mxu1 }
0x187d   : > { %v2647_v4 = vadd.f32 %v2635_v1, %v3822_v8  ;;  %v2627_v5 = vadd.f32 %v2626_v3, %v2547_v2 }
0x187e   : > { %v3109_v6 = vpop.f32.mrf.mxu1 }
0x187f   : > { %2651 = vst.msk [vmem:[#allocation2 + $0x10] sm:$0xff] %vm1088_vm10, %v2647_v4  ;;  %v2645_v9 = vadd.f32 %v2627_v5, %v3826_v40  ;;  %v2638_v11 = vadd.f32 %v3109_v6, %v2562_v62 }
0x1880   : > { %v2629_v13 = vpop.f32.mrf.mxu1 }
0x1881   : > { %2649 = vst.msk [vmem:[#allocation2] sm:$0xff] %vm1088_vm10, %v2645_v9  ;;  %v2648_v15 = vadd.f32 %v2638_v11, %v3831_v10  ;;  %v2630_v31 = vadd.f32 %v2629_v13, %v2552_v12 }
0x1883   : > { %2652 = vst.msk [vmem:[#allocation2 + $0x18] sm:$0xff] %vm1088_vm10, %v2648_v15  ;;  %v2646_v16 = vadd.f32 %v2630_v31, %v3836_v43 }
0x1885   : > { %2650 = vst.msk [vmem:[#allocation2 + $0x8] sm:$0xff] %vm1088_vm10, %v2646_v16 }
0x1886   : > { %v2655_v8 = vld [vmem:[#allocation2 + $0x10] sm:$0xff] }
0x1887   : > { %vm2659_vm7 = vcmp.ge.f32.partialorder %v2655_v8, 0.0  ;;  %v2663_v33 = vmul.f32 0.01, %v2655_v8 }
0x1888   : > { %v2653_v18 = vld [vmem:[#allocation2] sm:$0xff] }
0x1889   : > { %v2667_v17 = vsel %vm2659_vm7, %v2655_v8, %v2663_v33  ;;  %v2661_v40 = vmul.f32 0.01, %v2653_v18  ;;  %vm2657_vm8 = vcmp.ge.f32.partialorder %v2653_v18, 0.0 }
0x188a   : > { %2677 = vrot.lane.b32.xlu0 %v2667_v17, %s4032_s4  ;;  %v2656_v19 = vld [vmem:[#allocation2 + $0x18] sm:$0xff] }
0x188b   : > { %vm2660_vm11 = vcmp.ge.f32.partialorder %v2656_v19, 0.0  ;;  %v2664_v38 = vmul.f32 0.01, %v2656_v19  ;;  %v2665_v21 = vsel %vm2657_vm8, %v2653_v18, %v2661_v40 }
0x188c   : > { %v2654_v10 = vld [vmem:[#allocation2 + $0x8] sm:$0xff] }
0x188d   : > { %v2668_v36 = vsel %vm2660_vm11, %v2656_v19, %v2664_v38  ;;  %v2662_v22 = vmul.f32 0.01, %v2654_v10  ;;  %vm2658_vm10 = vcmp.ge.f32.partialorder %v2654_v10, 0.0 }
0x188e   : > { %2679 = vrot.lane.b32.xlu1 %v2668_v36, %s4032_s4  ;;  %2673 = vrot.lane.b32.xlu0 %v2665_v21, %s4032_s4 }
0x188f   : > { %v2666_v43 = vsel %vm2658_vm10, %v2654_v10, %v2662_v22 }
0x1892   : > { %2675 = vrot.lane.b32.xlu1 %v2666_v43, %s4032_s4 }
0x18fc   : > { %v2678_v23 = vpop.permute.xlu0 %2677 }
0x18fd   : > { %2687 = vst.msk [vmem:[#allocation3 + $0x10] sm:$0xff] %vm776_vm2, %v2678_v23 }
0x1900   : > { %v2680_v20 = vpop.permute.xlu1 %2679  ;;  %v2674_v24 = vpop.permute.xlu0 %2673 }
0x1901   : > { %2688 = vst.msk [vmem:[#allocation3 + $0x18] sm:$0xff] %vm776_vm2, %v2680_v20  ;;  %2685 = vst.msk [vmem:[#allocation3] sm:$0xff] %vm776_vm2, %v2674_v24 }
0x1904   : > { %v2676_v25 = vpop.permute.xlu1 %2675  ;;  %v2691_v26 = vld [vmem:[#allocation3 + $0x10] sm:$0xff] }
0x1905   : > { %2686 = vst.msk [vmem:[#allocation3 + $0x8] sm:$0xff] %vm776_vm2, %v2676_v25  ;;  %2708 = vrot.lane.b32.xlu0 %v2691_v26, %s4034_s7  ;;  %vm3273_vm2 = vmmov 0  }
0x1906   : > { %3120 = vmatprep.mubr.msk.bf16.mxu0 %vm3273_vm2, %v3263_v0 }
0x1908   : > { %v2692_v27 = vld [vmem:[#allocation3 + $0x18] sm:$0xff]  ;;  %v2689_v29 = vld [vmem:[#allocation3] sm:$0xff] }
0x1909   : > { %2712 = vrot.lane.b32.xlu1 %v2692_v27, %s4037_s9  ;;  %2705 = vrot.lane.b32.xlu0 %v2691_v26, %s4037_s9 }
0x190c   : > { %v2690_v28 = vld [vmem:[#allocation3 + $0x8] sm:$0xff] }
0x190d   : > { %2701 = vrot.lane.b32.xlu1 %v2690_v28, %s4034_s7  ;;  %2694 = vrot.lane.b32.xlu0 %v2689_v29, %s4034_s7 }
0x1911   : > { %2698 = vrot.lane.b32.xlu1 %v2690_v28, %s4037_s9 }
0x1977   : > { %v2709_v30 = vpop.permute.xlu0 %2708 }
0x1978   : > { %v2719_v32 = vpack.c.bf16 %v2709_v30, %v2691_v26 }
0x197a   : > { %2738 = vrot.lane.b32.xlu0 %v2719_v32, %s4033_s6 }
0x197b   : > { %v2713_v34 = vpop.permute.xlu1 %2712  ;;  %v2706_v35 = vpop.permute.xlu0 %2705 }
0x197c   : > { %v2720_v37 = vpack.c.bf16 %v2692_v27, %v2713_v34 }
0x197e   : > { %2740 = vrot.lane.b32.xlu1 %v2720_v37, %s4033_s6 }
0x197f   : > { %v2702_v39 = vpop.permute.xlu1 %2701  ;;  %v2695_v41 = vpop.permute.xlu0 %2694 }
0x1980   : > { %v2718_v7 = vpack.c.bf16 %v2706_v35, %v2702_v39  ;;  %v2716_v14 = vpack.c.bf16 %v2695_v41, %v2689_v29 }
0x1982   : > { %2736 = vrot.lane.b32.xlu1 %v2718_v7, %s4033_s6 }
0x1983   : > { %v2699_v42 = vpop.permute.xlu1 %2698 }
0x1984   : > { %v2717_v44 = vpack.c.bf16 %v2690_v28, %v2699_v42 }
0x1986   : > { %2734 = vrot.lane.b32.xlu0 %v2717_v44, %s4033_s6  ;;  %2732 = vrot.lane.b32.xlu1 %v2716_v14, %s4033_s6 }
0x198a   : > { %2724 = vperm.xlu0 %3145, %v2721_v45  }
0x19ec   : > { %v2739_v47 = vpop.permute.xlu0 %2738 }
0x19f0   : > { %v2741_v46 = vpop.permute.xlu1 %2740 }
0x19f1   : > { %3111 = vmatpush3.bf16.msra.mxu0 %v2741_v46 }
0x19f2   : > { %3112 = vmatprep.subr.bf16.mxu0 %v3263_v0 }
0x19f4   : > { %v2737_v48 = vpop.permute.xlu1 %2736 }
0x19f5   : > { %3113 = vmatpush3.bf16.msra.mxu0 %v2739_v47 }
0x19f6   : > { %3114 = vmatprep.subr.bf16.mxu0 %v3263_v0 }
0x19f8   : > { %v2735_v49 = vpop.permute.xlu0 %2734  ;;  %v2733_v50 = vpop.permute.xlu1 %2732 }
0x19f9   : > { %3115 = vmatpush3.bf16.msra.mxu0 %v2737_v48 }
0x19fa   : > { %3116 = vmatprep.subr.bf16.mxu0 %v3263_v0 }
0x19fd   : > { %3117 = vmatpush3.bf16.msra.mxu0 %v2735_v49 }
0x19fe   : > { %3118 = vmatprep.subr.bf16.mxu0 %v3263_v0 }
0x1a01   : > { %3119 = vmatpush3.bf16.msra.mxu0 %v2733_v50 }
0x1a04   : > { %3121 = vmatmul.mubr.msk.bf16.vlgmr.msra.gmra.mxu0 %vm2433_vm3, %v2715_v51 }
0x1a05   : > { %v2725_v52 = vpop.permute.xlu0 %2724 }
0x1ac4   : > { %v2784_v53 = vpop.f32.mrf.mxu0 }
0x1ac5   : > { %v2785_v54 = vadd.f32 %v2784_v53, %v2725_v52 }
0x1ac6   : > { %v3122_v55 = vpop.f32.mrf.mxu0 }
0x1ac7   : > { %3253 = vtanh.f32 %v2785_v54 }
0x1ac8   : > { %v2787_v56 = vpop.f32.mrf.mxu0 }
0x1aca   : > { %v3123_v57 = vpop.f32.mrf.mxu0 }
0x1ad4   : > { %v3254_v0 = vpop.eup %3253 }
0x1ad5   : > { %2792 = vst.msk [vmem:[%s759_s3] sm:$0xf] %vm2791_vm12, %v3254_v0 }
0x1ad6 PF: > { %s4043_s29 = sld [smem:[#allocation4_spill]] }
0x1adc   : > { %s35_s29 = sadd.s32 1, %s4043_s29  }
0x1add   : > { %p32_p4 = scmp.ge.s32.totalorder %s35_s29, 4  }
0x1adf   :  { %34 = sbr.rel (!%p32_p4) target bundleno = 12 (0xc), region = 150 }

</bundles_post_ra>
